<compile_context>
chip_gen: v5e
topology: v5e:2x2
jax: 0.10.0
libtpu: 0.0.40
codegen_flags: <defaults>
</compile_context>

<pallas_src>
import jax
import jax.numpy as jnp
from jax.experimental import pallas as pl
from jax.experimental.pallas import tpu as pltpu


# ----------------------------------------------------------------------------
# Kernels
# ----------------------------------------------------------------------------
def _attention_tiny_kernel(
    wg_ref,     # SMEM (C*F_g,)  BN-folded gate-conv weights (f32 scalars)
    wx_ref,     # SMEM (C*F_l,)  BN-folded skip-conv weights
    t_ref,      # SMEM (C,)      fused shift tg + tx
    wp_ref,     # SMEM (C,)      BN-folded psi weights
    tp_ref,     # SMEM (1,)      folded psi shift
    gate_ref,   # VMEM (NB, F_g, S, 128)  dense pixel slabs
    skip_ref,   # VMEM (NB, F_l, S, 128)
    out_ref,    # VMEM (NB, F_l, S, 128)
):
    """Tiny-channel path: unrolled VPU FMAs on dense (NB, S, 128) slabs."""
    F_g = gate_ref.shape[1]
    F_l = skip_ref.shape[1]
    C = t_ref.shape[0]

    # Upcast right after load: HBM transfer may be bf16, compute stays f32.
    gate = gate_ref[...].astype(jnp.float32)
    skip = skip_ref[...].astype(jnp.float32)

    # Hoist the per-channel slabs once (JAX does not CSE repeated slices).
    gate_ch = [gate[:, k] for k in range(F_g)]   # each (NB, S, 128)
    skip_ch = [skip[:, k] for k in range(F_l)]

    psi_pre = None
    for c in range(C):
        a = gate_ch[0] * wg_ref[c * F_g]
        for k in range(1, F_g):
            a = a + gate_ch[k] * wg_ref[c * F_g + k]
        for k in range(F_l):
            a = a + skip_ch[k] * wx_ref[c * F_l + k]
        a = jnp.maximum(a + t_ref[c], 0.0)       # relu(g1 + x1), channel c
        term = a * wp_ref[c]
        psi_pre = term if psi_pre is None else psi_pre + term

    psi = jax.nn.sigmoid(psi_pre + tp_ref[0])    # (NB, S, 128), EUP sigmoid

    # Gated skip connection; dense (sublane + lane) stores per channel.
    for k in range(F_l):
        out_ref[:, k] = (skip_ch[k] * psi).astype(out_ref.dtype)


def _attention_mxu_kernel(
    wg_ref,     # VMEM (C, F_g)  bf16 BN-folded gate-conv weights
    wx_ref,     # VMEM (C, F_l)  bf16 BN-folded skip-conv weights
    t_ref,      # VMEM (C, 1)    f32 fused shift
    wp_ref,     # VMEM (C, 1)    f32 psi weights
    tp_ref,     # SMEM (1,)      f32 psi shift
    gate_ref,   # VMEM (1, F_g, TP)
    skip_ref,   # VMEM (1, F_l, TP)
    out_ref,    # VMEM (1, F_l, TP)
):
    """Large-channel path: two accumulating bf16 MXU matmuls (no concat)."""
    gate = gate_ref[0]                           # (F_g, TP)
    skip = skip_ref[0]                           # (F_l, TP)

    acc = jnp.dot(wg_ref[...], gate.astype(jnp.bfloat16),
                  preferred_element_type=jnp.float32)
    acc = acc + jnp.dot(wx_ref[...], skip.astype(jnp.bfloat16),
                        preferred_element_type=jnp.float32)
    a = jnp.maximum(acc + t_ref[...], 0.0)       # (C, TP)

    # psi projection: sublane reduce over C (XLU) + EUP sigmoid.
    p = jnp.sum(a * wp_ref[...], axis=0, keepdims=True) + tp_ref[0]
    psi = jax.nn.sigmoid(p)                      # (1, TP)

    out_ref[0] = (skip.astype(jnp.float32) * psi).astype(out_ref.dtype)


# ----------------------------------------------------------------------------
# Tiling / VMEM planning
# ----------------------------------------------------------------------------
def _vmem_budgets():
    """(block-planning budget, vmem_limit_bytes) per TPU generation.

    v7x has 64 MiB VMEM per TensorCore; v4/v5e/v5p/v6e have 128 MiB.
    Unknown device kinds get the conservative (v7x) numbers."""
    kind = ""
    try:
        kind = jax.devices()[0].device_kind.lower()
    except Exception:
        pass
    if "v4" in kind or "v5" in kind or "v6" in kind:
        return 72 * 2**20, 96 * 2**20
    return 36 * 2**20, 48 * 2**20


def _plan_tiny_tiling(N, rows, step_row_bytes, vmem_row_bytes, budget, target,
                      sub_q):
    """Pick (rows_pad, S, NB) for the tiny-channel path.

    rows = number of 128-pixel lane rows; S = pixel-row block (sublane extent,
    TP = S*128 pixels); NB = images per grid step.  Never requests a block
    bigger than `budget`; pads the pixel axis when no aligned divisor exists.
    """
    if rows * vmem_row_bytes <= budget:
        rows_pad, S = rows, rows                   # full extent -> always legal
    else:
        s_fit = max(sub_q, (int(budget // vmem_row_bytes) // sub_q) * sub_q)
        S = 0
        d = sub_q
        while d <= min(s_fit, rows):
            if rows % d == 0:
                S = d
            d += sub_q
        if S:
            rows_pad = rows
        else:                                      # no aligned divisor: pad
            S = s_fit
            rows_pad = ((rows + S - 1) // S) * S

    NB = 1
    if S == rows_pad and N > 1:                    # whole image fits -> batch-block
        fit = max(1, int(budget // (S * vmem_row_bytes)))
        want = max(1, -(-target // (S * step_row_bytes)))   # ceil
        cap = min(fit, want, N)
        for d in range(1, N + 1):
            if N % d == 0 and d <= cap:
                NB = d
    return rows_pad, S, NB


def _plan_mxu_tiling(rows, step_row_bytes, vmem_row_bytes, budget, target):
    """Pick (rows_pad, S) for the MXU path; TP = S*128 pixels per block."""
    if rows * vmem_row_bytes <= budget:
        want = max(1, -(-target // step_row_bytes))
        if rows <= want:
            return rows, rows
        best = rows
        for d in range(1, rows + 1):               # smallest divisor >= want
            if rows % d == 0 and want <= d < best:
                best = d
        return rows, best
    s_fit = max(1, int(budget // vmem_row_bytes))
    best = 0
    for d in range(1, min(s_fit, rows) + 1):
        if rows % d == 0:
            best = d
    if best:
        return rows, best
    return ((rows + s_fit - 1) // s_fit) * s_fit, s_fit


# ----------------------------------------------------------------------------
# Wrapper
# ----------------------------------------------------------------------------
def attention_block_pallas(gate, skip, folded, *, target_step_bytes=2 * 2**20):
    """gate: (N, F_g, H, W), skip: (N, F_l, H, W)  -> (N, F_l, H, W).

    `folded` comes from fold_params() (eval-mode BN folded into the convs).
    Inputs may be float32 or bfloat16 (bf16 halves HBM traffic); compute and
    accumulation are f32 inside the kernel.  Output dtype == skip dtype.
    """
    N, F_g, H, W = gate.shape
    _, F_l, _, _ = skip.shape
    C = folded["t"].shape[0]
    HW = H * W
    out_dtype = skip.dtype

    g_item = jnp.dtype(gate.dtype).itemsize
    s_item = jnp.dtype(skip.dtype).itemsize
    o_item = jnp.dtype(out_dtype).itemsize
    step_pp = F_g * g_item + F_l * s_item + F_l * o_item   # HBM bytes / pixel

    blk_budget, vmem_limit = _vmem_budgets()
    rows = pl.cdiv(HW, 128)

    # Channel-major views: pure reshapes, no transposes.
    gate3 = gate.reshape(N, F_g, HW)
    skip3 = skip.reshape(N, F_l, HW)

    flops = 2 * N * HW * (C * (F_g + F_l + 1) + F_l)
    cost = pl.CostEstimate(flops=flops, transcendentals=N * HW,
                           bytes_accessed=N * HW * step_pp)
    smem_spec = pl.BlockSpec(memory_space=pltpu.MemorySpace.SMEM)

    if (F_g + F_l) <= 32 and C <= 32:
        # ---------------- tiny-channel VPU path ----------------
        # VMEM per 128-pixel row (NB=1): double-buffered HBM blocks + f32
        # upcast copies + a / psi / per-channel output temporaries.
        vmem_pr = 128 * (2 * step_pp + 4 * (F_g + 2 * F_l + 3))
        sub_q = 8 if min(g_item, s_item, o_item) >= 4 else 16
        rows_pad, S, NB = _plan_tiny_tiling(
            N, rows, 128 * step_pp, vmem_pr, blk_budget, target_step_bytes,
            sub_q)
        HW_pad = rows_pad * 128
        if HW_pad != HW:
            pad = HW_pad - HW
            gate3 = jnp.pad(gate3, ((0, 0), (0, 0), (0, pad)))
            skip3 = jnp.pad(skip3, ((0, 0), (0, 0), (0, pad)))

        gate4 = gate3.reshape(N, F_g, rows_pad, 128)
        skip4 = skip3.reshape(N, F_l, rows_pad, 128)
        grid = (N // NB, rows_pad // S)

        def pix_spec(c):
            return pl.BlockSpec((NB, c, S, 128), lambda n, p: (n, 0, p, 0))

        out4 = pl.pallas_call(
            _attention_tiny_kernel,
            out_shape=jax.ShapeDtypeStruct((N, F_l, rows_pad, 128), out_dtype),
            grid_spec=pltpu.PrefetchScalarGridSpec(
                num_scalar_prefetch=0,
                grid=grid,
                in_specs=[smem_spec, smem_spec, smem_spec, smem_spec, smem_spec,
                          pix_spec(F_g), pix_spec(F_l)],
                out_specs=pix_spec(F_l),
            ),
            compiler_params=pltpu.CompilerParams(
                dimension_semantics=("parallel", "parallel"),
                vmem_limit_bytes=vmem_limit,
            ),
            cost_estimate=cost,
        )(folded["wg"].reshape(-1), folded["wx"].reshape(-1),
          folded["t"], folded["wp"], folded["tp"], gate4, skip4)

        out3 = out4.reshape(N, F_l, HW_pad)
        if HW_pad != HW:
            out3 = out3[:, :, :HW]
        return out3.reshape(N, F_l, H, W)

    # ---------------- large-channel MXU path ----------------
    # VMEM per 128-pixel row: double-buffered HBM blocks + bf16 operand casts
    # + f32 acc/a + f32 output temporaries.
    vmem_pr = 128 * (2 * step_pp + 2 * (F_g + F_l) + 4 * (2 * C + F_l + 3))
    rows_pad, S = _plan_mxu_tiling(rows, 128 * step_pp, vmem_pr,
                                   blk_budget, target_step_bytes)
    TP = S * 128
    HW_pad = rows_pad * 128
    if HW_pad != HW:
        pad = HW_pad - HW
        gate3 = jnp.pad(gate3, ((0, 0), (0, 0), (0, pad)))
        skip3 = jnp.pad(skip3, ((0, 0), (0, 0), (0, pad)))
    grid = (N, HW_pad // TP)

    def pix_spec(c):
        return pl.BlockSpec((1, c, TP), lambda n, p: (n, 0, p))

    def w_spec(shape):
        # Grid-invariant weights (Pallas fetches them once).
        return pl.BlockSpec(shape, lambda n, p: (0, 0))

    out3 = pl.pallas_call(
        _attention_mxu_kernel,
        out_shape=jax.ShapeDtypeStruct((N, F_l, HW_pad), out_dtype),
        grid_spec=pltpu.PrefetchScalarGridSpec(
            num_scalar_prefetch=0,
            grid=grid,
            in_specs=[
                w_spec((C, F_g)),
                w_spec((C, F_l)),
                w_spec((C, 1)),
                w_spec((C, 1)),
                smem_spec,
                pix_spec(F_g),
                pix_spec(F_l),
            ],
            out_specs=pix_spec(F_l),
        ),
        compiler_params=pltpu.CompilerParams(
            dimension_semantics=("parallel", "parallel"),
            vmem_limit_bytes=vmem_limit,
        ),
        cost_estimate=cost,
    )(folded["wg"].astype(jnp.bfloat16), folded["wx"].astype(jnp.bfloat16),
      folded["t"][:, None], folded["wp"][:, None], folded["tp"],
      gate3, skip3)

    if HW_pad != HW:
        out3 = out3[:, :, :HW]
    return out3.reshape(N, F_l, H, W)


# ----------------------------------------------------------------------------
# Deterministic parameter construction (synthetic; no checkpoint load)
# ----------------------------------------------------------------------------
def make_params(key, F_g, F_l, C):
    """Raw module parameters: conv weights in (out, in) layout + eval-BN stats."""
    ks = jax.random.split(key, 12)

    wg = 0.3 * jax.random.normal(ks[0], (C, F_g), jnp.float32)
    bg = 0.1 * jax.random.normal(ks[1], (C,), jnp.float32)
    wx = 0.3 * jax.random.normal(ks[2], (C, F_l), jnp.float32)
    bx = 0.1 * jax.random.normal(ks[3], (C,), jnp.float32)
    wp = 0.3 * jax.random.normal(ks[4], (1, C), jnp.float32)
    bp = 0.1 * jax.random.normal(ks[5], (1,), jnp.float32)

    g_gamma = 1.0 + 0.1 * jax.random.normal(ks[6], (C,), jnp.float32)
    g_beta = 0.05 * jax.random.normal(ks[7], (C,), jnp.float32)
    g_mean = 0.1 * jax.random.normal(ks[8], (C,), jnp.float32)
    g_var = 1.0 + 0.1 * jnp.abs(jax.random.normal(ks[9], (C,), jnp.float32))

    x_gamma = 1.0 + 0.1 * jax.random.normal(ks[10], (C,), jnp.float32)
    x_beta = 0.05 * jax.random.normal(ks[11], (C,), jnp.float32)
    x_mean = jnp.linspace(-0.1, 0.1, C, dtype=jnp.float32)
    x_var = jnp.linspace(0.9, 1.1, C, dtype=jnp.float32)

    p_gamma = jnp.array([1.05], jnp.float32)
    p_beta = jnp.array([-0.02], jnp.float32)
    p_mean = jnp.array([0.03], jnp.float32)
    p_var = jnp.array([0.97], jnp.float32)

    return {
        "wg": wg, "bg": bg, "wx": wx, "bx": bx, "wp": wp, "bp": bp,
        "g_gamma": g_gamma, "g_beta": g_beta, "g_mean": g_mean, "g_var": g_var,
        "x_gamma": x_gamma, "x_beta": x_beta, "x_mean": x_mean, "x_var": x_var,
        "p_gamma": p_gamma, "p_beta": p_beta, "p_mean": p_mean, "p_var": p_var,
    }


def fold_params(raw, eps=1e-5):
    """Fold eval-mode BN into the conv weights; keep the two branches separate."""
    def scale_shift(b, gamma, beta, mean, var):
        s = gamma / jnp.sqrt(var + eps)          # per-channel scale
        t = (b - mean) * s + beta                # per-channel shift
        return s, t

    sg, tg = scale_shift(raw["bg"], raw["g_gamma"], raw["g_beta"],
                         raw["g_mean"], raw["g_var"])
    sx, tx = scale_shift(raw["bx"], raw["x_gamma"], raw["x_beta"],
                         raw["x_mean"], raw["x_var"])
    sp, tp = scale_shift(raw["bp"], raw["p_gamma"], raw["p_beta"],
                         raw["p_mean"], raw["p_var"])

    return {
        "wg": (raw["wg"] * sg[:, None]).astype(jnp.float32),   # (C, F_g)
        "wx": (raw["wx"] * sx[:, None]).astype(jnp.float32),   # (C, F_l)
        "t": (tg + tx).astype(jnp.float32),                    # (C,)
        "wp": (raw["wp"][0] * sp[0]).astype(jnp.float32),      # (C,)
        "tp": tp.reshape(1).astype(jnp.float32),               # (1,)
    }


# Pure-JAX reference using the UNFOLDED module math (conv + eval-BN separately)
# so the check also validates the BN folding done for the kernel.
def attention_block_ref(gate, skip, raw, eps=1e-5):
    def conv_bn(x, w, b, gamma, beta, mean, var):
        y = jnp.einsum("oc,nchw->nohw", w, x) + b[None, :, None, None]
        inv = gamma / jnp.sqrt(var + eps)
        return ((y - mean[None, :, None, None]) * inv[None, :, None, None]
                + beta[None, :, None, None])

    g1 = conv_bn(gate, raw["wg"], raw["bg"], raw["g_gamma"], raw["g_beta"],
                 raw["g_mean"], raw["g_var"])
    x1 = conv_bn(skip, raw["wx"], raw["bx"], raw["x_gamma"], raw["x_beta"],
                 raw["x_mean"], raw["x_var"])
    a = jnp.maximum(g1 + x1, 0.0)
    p = conv_bn(a, raw["wp"], raw["bp"], raw["p_gamma"], raw["p_beta"],
                raw["p_mean"], raw["p_var"])
    psi = jax.nn.sigmoid(p)                      # (N, 1, H, W)
    return skip * psi


if __name__ == "__main__":
    # Shapes consistent with the module: batch=2, F_g=F_l=4, n_coefficients=8,
    # spatial 16x16  -> 256 pixels per image (tiny-channel VPU path).
    N, F_g, F_l, C, Hs, Ws = 2, 4, 4, 8, 16, 16

    key = jax.random.PRNGKey(0)
    k_gate, k_skip, k_param, k_more = jax.random.split(key, 4)

    gate = jax.random.normal(k_gate, (N, F_g, Hs, Ws), jnp.float32)
    skip = jax.random.normal(k_skip, (N, F_l, Hs, Ws), jnp.float32)

    raw = make_params(k_param, F_g, F_l, C)
    folded = fold_params(raw)

    run = jax.jit(attention_block_pallas)

    # f32 path: strict check against the unfolded reference.
    out = jax.block_until_ready(run(gate, skip, folded))
    ref = attention_block_ref(gate, skip, raw)
    assert out.shape == (N, F_l, Hs, Ws)
    assert jnp.allclose(out, ref, atol=1e-5, rtol=1e-5), "mismatch vs reference"

    # bf16 HBM-transfer path (halves input/output bytes; f32 compute inside).
    out_bf16 = jax.block_until_ready(
        run(gate.astype(jnp.bfloat16), skip.astype(jnp.bfloat16), folded))
    assert out_bf16.dtype == jnp.bfloat16
    assert jnp.allclose(out_bf16.astype(jnp.float32), ref, atol=0.1, rtol=0.1), \
        "bf16 path mismatch vs reference"

    # Larger channel counts exercise the MXU path (bf16 operands, f32 accum).
    F_g2, F_l2, C2 = 24, 24, 40
    kg2, ks2, kp2 = jax.random.split(k_more, 3)
    gate2 = jax.random.normal(kg2, (N, F_g2, Hs, Ws), jnp.float32)
    skip2 = jax.random.normal(ks2, (N, F_l2, Hs, Ws), jnp.float32)
    raw2 = make_params(kp2, F_g2, F_l2, C2)
    folded2 = fold_params(raw2)
    out2 = jax.block_until_ready(run(gate2, skip2, folded2))
    ref2 = attention_block_ref(gate2, skip2, raw2)
    assert out2.shape == (N, F_l2, Hs, Ws)
    assert jnp.allclose(out2, ref2, atol=0.1, rtol=0.1), \
        "MXU path mismatch vs reference"

    print("KERNEL_OK")
</pallas_src>

<mosaic_0001>
module attributes {stable_mosaic.version = 11 : i64} {
  func.func @_attention_tiny_kernel(%arg0: i32, %arg1: i32, %arg2: memref<32xf32, #tpu.memory_space<smem>>, %arg3: memref<32xf32, #tpu.memory_space<smem>>, %arg4: memref<8xf32, #tpu.memory_space<smem>>, %arg5: memref<8xf32, #tpu.memory_space<smem>>, %arg6: memref<1xf32, #tpu.memory_space<smem>>, %arg7: memref<2x4x2x128xf32, #tpu.memory_space<vmem>>, %arg8: memref<2x4x2x128xf32, #tpu.memory_space<vmem>>, %arg9: memref<2x4x2x128xf32, #tpu.memory_space<vmem>>) attributes {dimension_semantics = [#tpu.dimension_semantics<parallel>, #tpu.dimension_semantics<parallel>], iteration_bounds = array<i64: 1, 1>, scalar_prefetch = 0 : i64, scratch_operands = 0 : i64, tpu.core_type = #tpu.core_type<tc>, window_params = [{transform_indices = @transform_0, window_bounds = array<i64: 32>}, {transform_indices = @transform_1, window_bounds = array<i64: 32>}, {transform_indices = @transform_2, window_bounds = array<i64: 8>}, {transform_indices = @transform_3, window_bounds = array<i64: 8>}, {transform_indices = @transform_4, window_bounds = array<i64: 1>}, {transform_indices = @transform_5, window_bounds = array<i64: 2, 4, 2, 128>}, {transform_indices = @transform_6, window_bounds = array<i64: 2, 4, 2, 128>}, {transform_indices = @transform_7, window_bounds = array<i64: 2, 4, 2, 128>}]} {
    %c0 = arith.constant 0 : index
    %c0_0 = arith.constant 0 : index
    %c0_1 = arith.constant 0 : index
    %c0_2 = arith.constant 0 : index
    %0 = vector.load %arg7[%c0, %c0_0, %c0_1, %c0_2] : memref<2x4x2x128xf32, #tpu.memory_space<vmem>>, vector<2x4x2x128xf32>
    %c0_3 = arith.constant 0 : index
    %c0_4 = arith.constant 0 : index
    %c0_5 = arith.constant 0 : index
    %c0_6 = arith.constant 0 : index
    %1 = vector.load %arg8[%c0_3, %c0_4, %c0_5, %c0_6] : memref<2x4x2x128xf32, #tpu.memory_space<vmem>>, vector<2x4x2x128xf32>
    %2 = vector.extract_strided_slice %0 {offsets = [0, 0, 0, 0], sizes = [2, 1, 2, 128], strides = [1, 1, 1, 1]} : vector<2x4x2x128xf32> to vector<2x1x2x128xf32>
    %3 = vector.shape_cast %2 : vector<2x1x2x128xf32> to vector<2x2x128xf32>
    %4 = vector.extract_strided_slice %0 {offsets = [0, 1, 0, 0], sizes = [2, 1, 2, 128], strides = [1, 1, 1, 1]} : vector<2x4x2x128xf32> to vector<2x1x2x128xf32>
    %5 = vector.shape_cast %4 : vector<2x1x2x128xf32> to vector<2x2x128xf32>
    %6 = vector.extract_strided_slice %0 {offsets = [0, 2, 0, 0], sizes = [2, 1, 2, 128], strides = [1, 1, 1, 1]} : vector<2x4x2x128xf32> to vector<2x1x2x128xf32>
    %7 = vector.shape_cast %6 : vector<2x1x2x128xf32> to vector<2x2x128xf32>
    %8 = vector.extract_strided_slice %0 {offsets = [0, 3, 0, 0], sizes = [2, 1, 2, 128], strides = [1, 1, 1, 1]} : vector<2x4x2x128xf32> to vector<2x1x2x128xf32>
    %9 = vector.shape_cast %8 : vector<2x1x2x128xf32> to vector<2x2x128xf32>
    %10 = vector.extract_strided_slice %1 {offsets = [0, 0, 0, 0], sizes = [2, 1, 2, 128], strides = [1, 1, 1, 1]} : vector<2x4x2x128xf32> to vector<2x1x2x128xf32>
    %11 = vector.shape_cast %10 : vector<2x1x2x128xf32> to vector<2x2x128xf32>
    %12 = vector.extract_strided_slice %1 {offsets = [0, 1, 0, 0], sizes = [2, 1, 2, 128], strides = [1, 1, 1, 1]} : vector<2x4x2x128xf32> to vector<2x1x2x128xf32>
    %13 = vector.shape_cast %12 : vector<2x1x2x128xf32> to vector<2x2x128xf32>
    %14 = vector.extract_strided_slice %1 {offsets = [0, 2, 0, 0], sizes = [2, 1, 2, 128], strides = [1, 1, 1, 1]} : vector<2x4x2x128xf32> to vector<2x1x2x128xf32>
    %15 = vector.shape_cast %14 : vector<2x1x2x128xf32> to vector<2x2x128xf32>
    %16 = vector.extract_strided_slice %1 {offsets = [0, 3, 0, 0], sizes = [2, 1, 2, 128], strides = [1, 1, 1, 1]} : vector<2x4x2x128xf32> to vector<2x1x2x128xf32>
    %17 = vector.shape_cast %16 : vector<2x1x2x128xf32> to vector<2x2x128xf32>
    %c0_7 = arith.constant 0 : index
    %18 = memref.load %arg2[%c0_7] : memref<32xf32, #tpu.memory_space<smem>>
    %19 = vector.broadcast %18 : f32 to vector<2x2x128xf32>
    %20 = arith.mulf %3, %19 : vector<2x2x128xf32>
    %c1 = arith.constant 1 : index
    %21 = memref.load %arg2[%c1] : memref<32xf32, #tpu.memory_space<smem>>
    %22 = vector.broadcast %21 : f32 to vector<2x2x128xf32>
    %23 = arith.mulf %5, %22 : vector<2x2x128xf32>
    %24 = arith.addf %20, %23 : vector<2x2x128xf32>
    %c2 = arith.constant 2 : index
    %25 = memref.load %arg2[%c2] : memref<32xf32, #tpu.memory_space<smem>>
    %26 = vector.broadcast %25 : f32 to vector<2x2x128xf32>
    %27 = arith.mulf %7, %26 : vector<2x2x128xf32>
    %28 = arith.addf %24, %27 : vector<2x2x128xf32>
    %c3 = arith.constant 3 : index
    %29 = memref.load %arg2[%c3] : memref<32xf32, #tpu.memory_space<smem>>
    %30 = vector.broadcast %29 : f32 to vector<2x2x128xf32>
    %31 = arith.mulf %9, %30 : vector<2x2x128xf32>
    %32 = arith.addf %28, %31 : vector<2x2x128xf32>
    %c0_8 = arith.constant 0 : index
    %33 = memref.load %arg3[%c0_8] : memref<32xf32, #tpu.memory_space<smem>>
    %34 = vector.broadcast %33 : f32 to vector<2x2x128xf32>
    %35 = arith.mulf %11, %34 : vector<2x2x128xf32>
    %36 = arith.addf %32, %35 : vector<2x2x128xf32>
    %c1_9 = arith.constant 1 : index
    %37 = memref.load %arg3[%c1_9] : memref<32xf32, #tpu.memory_space<smem>>
    %38 = vector.broadcast %37 : f32 to vector<2x2x128xf32>
    %39 = arith.mulf %13, %38 : vector<2x2x128xf32>
    %40 = arith.addf %36, %39 : vector<2x2x128xf32>
    %c2_10 = arith.constant 2 : index
    %41 = memref.load %arg3[%c2_10] : memref<32xf32, #tpu.memory_space<smem>>
    %42 = vector.broadcast %41 : f32 to vector<2x2x128xf32>
    %43 = arith.mulf %15, %42 : vector<2x2x128xf32>
    %44 = arith.addf %40, %43 : vector<2x2x128xf32>
    %c3_11 = arith.constant 3 : index
    %45 = memref.load %arg3[%c3_11] : memref<32xf32, #tpu.memory_space<smem>>
    %46 = vector.broadcast %45 : f32 to vector<2x2x128xf32>
    %47 = arith.mulf %17, %46 : vector<2x2x128xf32>
    %48 = arith.addf %44, %47 : vector<2x2x128xf32>
    %c0_12 = arith.constant 0 : index
    %49 = memref.load %arg4[%c0_12] : memref<8xf32, #tpu.memory_space<smem>>
    %50 = vector.broadcast %49 : f32 to vector<2x2x128xf32>
    %51 = arith.addf %48, %50 : vector<2x2x128xf32>
    %cst = arith.constant 0.000000e+00 : f32
    %52 = vector.broadcast %cst : f32 to vector<2x2x128xf32>
    %53 = arith.maximumf %51, %52 : vector<2x2x128xf32>
    %c0_13 = arith.constant 0 : index
    %54 = memref.load %arg5[%c0_13] : memref<8xf32, #tpu.memory_space<smem>>
    %55 = vector.broadcast %54 : f32 to vector<2x2x128xf32>
    %56 = arith.mulf %53, %55 : vector<2x2x128xf32>
    %c4 = arith.constant 4 : index
    %57 = memref.load %arg2[%c4] : memref<32xf32, #tpu.memory_space<smem>>
    %58 = vector.broadcast %57 : f32 to vector<2x2x128xf32>
    %59 = arith.mulf %3, %58 : vector<2x2x128xf32>
    %c5 = arith.constant 5 : index
    %60 = memref.load %arg2[%c5] : memref<32xf32, #tpu.memory_space<smem>>
    %61 = vector.broadcast %60 : f32 to vector<2x2x128xf32>
    %62 = arith.mulf %5, %61 : vector<2x2x128xf32>
    %63 = arith.addf %59, %62 : vector<2x2x128xf32>
    %c6 = arith.constant 6 : index
    %64 = memref.load %arg2[%c6] : memref<32xf32, #tpu.memory_space<smem>>
    %65 = vector.broadcast %64 : f32 to vector<2x2x128xf32>
    %66 = arith.mulf %7, %65 : vector<2x2x128xf32>
    %67 = arith.addf %63, %66 : vector<2x2x128xf32>
    %c7 = arith.constant 7 : index
    %68 = memref.load %arg2[%c7] : memref<32xf32, #tpu.memory_space<smem>>
    %69 = vector.broadcast %68 : f32 to vector<2x2x128xf32>
    %70 = arith.mulf %9, %69 : vector<2x2x128xf32>
    %71 = arith.addf %67, %70 : vector<2x2x128xf32>
    %c4_14 = arith.constant 4 : index
    %72 = memref.load %arg3[%c4_14] : memref<32xf32, #tpu.memory_space<smem>>
    %73 = vector.broadcast %72 : f32 to vector<2x2x128xf32>
    %74 = arith.mulf %11, %73 : vector<2x2x128xf32>
    %75 = arith.addf %71, %74 : vector<2x2x128xf32>
    %c5_15 = arith.constant 5 : index
    %76 = memref.load %arg3[%c5_15] : memref<32xf32, #tpu.memory_space<smem>>
    %77 = vector.broadcast %76 : f32 to vector<2x2x128xf32>
    %78 = arith.mulf %13, %77 : vector<2x2x128xf32>
    %79 = arith.addf %75, %78 : vector<2x2x128xf32>
    %c6_16 = arith.constant 6 : index
    %80 = memref.load %arg3[%c6_16] : memref<32xf32, #tpu.memory_space<smem>>
    %81 = vector.broadcast %80 : f32 to vector<2x2x128xf32>
    %82 = arith.mulf %15, %81 : vector<2x2x128xf32>
    %83 = arith.addf %79, %82 : vector<2x2x128xf32>
    %c7_17 = arith.constant 7 : index
    %84 = memref.load %arg3[%c7_17] : memref<32xf32, #tpu.memory_space<smem>>
    %85 = vector.broadcast %84 : f32 to vector<2x2x128xf32>
    %86 = arith.mulf %17, %85 : vector<2x2x128xf32>
    %87 = arith.addf %83, %86 : vector<2x2x128xf32>
    %c1_18 = arith.constant 1 : index
    %88 = memref.load %arg4[%c1_18] : memref<8xf32, #tpu.memory_space<smem>>
    %89 = vector.broadcast %88 : f32 to vector<2x2x128xf32>
    %90 = arith.addf %87, %89 : vector<2x2x128xf32>
    %cst_19 = arith.constant 0.000000e+00 : f32
    %91 = vector.broadcast %cst_19 : f32 to vector<2x2x128xf32>
    %92 = arith.maximumf %90, %91 : vector<2x2x128xf32>
    %c1_20 = arith.constant 1 : index
    %93 = memref.load %arg5[%c1_20] : memref<8xf32, #tpu.memory_space<smem>>
    %94 = vector.broadcast %93 : f32 to vector<2x2x128xf32>
    %95 = arith.mulf %92, %94 : vector<2x2x128xf32>
    %96 = arith.addf %56, %95 : vector<2x2x128xf32>
    %c8 = arith.constant 8 : index
    %97 = memref.load %arg2[%c8] : memref<32xf32, #tpu.memory_space<smem>>
    %98 = vector.broadcast %97 : f32 to vector<2x2x128xf32>
    %99 = arith.mulf %3, %98 : vector<2x2x128xf32>
    %c9 = arith.constant 9 : index
    %100 = memref.load %arg2[%c9] : memref<32xf32, #tpu.memory_space<smem>>
    %101 = vector.broadcast %100 : f32 to vector<2x2x128xf32>
    %102 = arith.mulf %5, %101 : vector<2x2x128xf32>
    %103 = arith.addf %99, %102 : vector<2x2x128xf32>
    %c10 = arith.constant 10 : index
    %104 = memref.load %arg2[%c10] : memref<32xf32, #tpu.memory_space<smem>>
    %105 = vector.broadcast %104 : f32 to vector<2x2x128xf32>
    %106 = arith.mulf %7, %105 : vector<2x2x128xf32>
    %107 = arith.addf %103, %106 : vector<2x2x128xf32>
    %c11 = arith.constant 11 : index
    %108 = memref.load %arg2[%c11] : memref<32xf32, #tpu.memory_space<smem>>
    %109 = vector.broadcast %108 : f32 to vector<2x2x128xf32>
    %110 = arith.mulf %9, %109 : vector<2x2x128xf32>
    %111 = arith.addf %107, %110 : vector<2x2x128xf32>
    %c8_21 = arith.constant 8 : index
    %112 = memref.load %arg3[%c8_21] : memref<32xf32, #tpu.memory_space<smem>>
    %113 = vector.broadcast %112 : f32 to vector<2x2x128xf32>
    %114 = arith.mulf %11, %113 : vector<2x2x128xf32>
    %115 = arith.addf %111, %114 : vector<2x2x128xf32>
    %c9_22 = arith.constant 9 : index
    %116 = memref.load %arg3[%c9_22] : memref<32xf32, #tpu.memory_space<smem>>
    %117 = vector.broadcast %116 : f32 to vector<2x2x128xf32>
    %118 = arith.mulf %13, %117 : vector<2x2x128xf32>
    %119 = arith.addf %115, %118 : vector<2x2x128xf32>
    %c10_23 = arith.constant 10 : index
    %120 = memref.load %arg3[%c10_23] : memref<32xf32, #tpu.memory_space<smem>>
    %121 = vector.broadcast %120 : f32 to vector<2x2x128xf32>
    %122 = arith.mulf %15, %121 : vector<2x2x128xf32>
    %123 = arith.addf %119, %122 : vector<2x2x128xf32>
    %c11_24 = arith.constant 11 : index
    %124 = memref.load %arg3[%c11_24] : memref<32xf32, #tpu.memory_space<smem>>
    %125 = vector.broadcast %124 : f32 to vector<2x2x128xf32>
    %126 = arith.mulf %17, %125 : vector<2x2x128xf32>
    %127 = arith.addf %123, %126 : vector<2x2x128xf32>
    %c2_25 = arith.constant 2 : index
    %128 = memref.load %arg4[%c2_25] : memref<8xf32, #tpu.memory_space<smem>>
    %129 = vector.broadcast %128 : f32 to vector<2x2x128xf32>
    %130 = arith.addf %127, %129 : vector<2x2x128xf32>
    %cst_26 = arith.constant 0.000000e+00 : f32
    %131 = vector.broadcast %cst_26 : f32 to vector<2x2x128xf32>
    %132 = arith.maximumf %130, %131 : vector<2x2x128xf32>
    %c2_27 = arith.constant 2 : index
    %133 = memref.load %arg5[%c2_27] : memref<8xf32, #tpu.memory_space<smem>>
    %134 = vector.broadcast %133 : f32 to vector<2x2x128xf32>
    %135 = arith.mulf %132, %134 : vector<2x2x128xf32>
    %136 = arith.addf %96, %135 : vector<2x2x128xf32>
    %c12 = arith.constant 12 : index
    %137 = memref.load %arg2[%c12] : memref<32xf32, #tpu.memory_space<smem>>
    %138 = vector.broadcast %137 : f32 to vector<2x2x128xf32>
    %139 = arith.mulf %3, %138 : vector<2x2x128xf32>
    %c13 = arith.constant 13 : index
    %140 = memref.load %arg2[%c13] : memref<32xf32, #tpu.memory_space<smem>>
    %141 = vector.broadcast %140 : f32 to vector<2x2x128xf32>
    %142 = arith.mulf %5, %141 : vector<2x2x128xf32>
    %143 = arith.addf %139, %142 : vector<2x2x128xf32>
    %c14 = arith.constant 14 : index
    %144 = memref.load %arg2[%c14] : memref<32xf32, #tpu.memory_space<smem>>
    %145 = vector.broadcast %144 : f32 to vector<2x2x128xf32>
    %146 = arith.mulf %7, %145 : vector<2x2x128xf32>
    %147 = arith.addf %143, %146 : vector<2x2x128xf32>
    %c15 = arith.constant 15 : index
    %148 = memref.load %arg2[%c15] : memref<32xf32, #tpu.memory_space<smem>>
    %149 = vector.broadcast %148 : f32 to vector<2x2x128xf32>
    %150 = arith.mulf %9, %149 : vector<2x2x128xf32>
    %151 = arith.addf %147, %150 : vector<2x2x128xf32>
    %c12_28 = arith.constant 12 : index
    %152 = memref.load %arg3[%c12_28] : memref<32xf32, #tpu.memory_space<smem>>
    %153 = vector.broadcast %152 : f32 to vector<2x2x128xf32>
    %154 = arith.mulf %11, %153 : vector<2x2x128xf32>
    %155 = arith.addf %151, %154 : vector<2x2x128xf32>
    %c13_29 = arith.constant 13 : index
    %156 = memref.load %arg3[%c13_29] : memref<32xf32, #tpu.memory_space<smem>>
    %157 = vector.broadcast %156 : f32 to vector<2x2x128xf32>
    %158 = arith.mulf %13, %157 : vector<2x2x128xf32>
    %159 = arith.addf %155, %158 : vector<2x2x128xf32>
    %c14_30 = arith.constant 14 : index
    %160 = memref.load %arg3[%c14_30] : memref<32xf32, #tpu.memory_space<smem>>
    %161 = vector.broadcast %160 : f32 to vector<2x2x128xf32>
    %162 = arith.mulf %15, %161 : vector<2x2x128xf32>
    %163 = arith.addf %159, %162 : vector<2x2x128xf32>
    %c15_31 = arith.constant 15 : index
    %164 = memref.load %arg3[%c15_31] : memref<32xf32, #tpu.memory_space<smem>>
    %165 = vector.broadcast %164 : f32 to vector<2x2x128xf32>
    %166 = arith.mulf %17, %165 : vector<2x2x128xf32>
    %167 = arith.addf %163, %166 : vector<2x2x128xf32>
    %c3_32 = arith.constant 3 : index
    %168 = memref.load %arg4[%c3_32] : memref<8xf32, #tpu.memory_space<smem>>
    %169 = vector.broadcast %168 : f32 to vector<2x2x128xf32>
    %170 = arith.addf %167, %169 : vector<2x2x128xf32>
    %cst_33 = arith.constant 0.000000e+00 : f32
    %171 = vector.broadcast %cst_33 : f32 to vector<2x2x128xf32>
    %172 = arith.maximumf %170, %171 : vector<2x2x128xf32>
    %c3_34 = arith.constant 3 : index
    %173 = memref.load %arg5[%c3_34] : memref<8xf32, #tpu.memory_space<smem>>
    %174 = vector.broadcast %173 : f32 to vector<2x2x128xf32>
    %175 = arith.mulf %172, %174 : vector<2x2x128xf32>
    %176 = arith.addf %136, %175 : vector<2x2x128xf32>
    %c16 = arith.constant 16 : index
    %177 = memref.load %arg2[%c16] : memref<32xf32, #tpu.memory_space<smem>>
    %178 = vector.broadcast %177 : f32 to vector<2x2x128xf32>
    %179 = arith.mulf %3, %178 : vector<2x2x128xf32>
    %c17 = arith.constant 17 : index
    %180 = memref.load %arg2[%c17] : memref<32xf32, #tpu.memory_space<smem>>
    %181 = vector.broadcast %180 : f32 to vector<2x2x128xf32>
    %182 = arith.mulf %5, %181 : vector<2x2x128xf32>
    %183 = arith.addf %179, %182 : vector<2x2x128xf32>
    %c18 = arith.constant 18 : index
    %184 = memref.load %arg2[%c18] : memref<32xf32, #tpu.memory_space<smem>>
    %185 = vector.broadcast %184 : f32 to vector<2x2x128xf32>
    %186 = arith.mulf %7, %185 : vector<2x2x128xf32>
    %187 = arith.addf %183, %186 : vector<2x2x128xf32>
    %c19 = arith.constant 19 : index
    %188 = memref.load %arg2[%c19] : memref<32xf32, #tpu.memory_space<smem>>
    %189 = vector.broadcast %188 : f32 to vector<2x2x128xf32>
    %190 = arith.mulf %9, %189 : vector<2x2x128xf32>
    %191 = arith.addf %187, %190 : vector<2x2x128xf32>
    %c16_35 = arith.constant 16 : index
    %192 = memref.load %arg3[%c16_35] : memref<32xf32, #tpu.memory_space<smem>>
    %193 = vector.broadcast %192 : f32 to vector<2x2x128xf32>
    %194 = arith.mulf %11, %193 : vector<2x2x128xf32>
    %195 = arith.addf %191, %194 : vector<2x2x128xf32>
    %c17_36 = arith.constant 17 : index
    %196 = memref.load %arg3[%c17_36] : memref<32xf32, #tpu.memory_space<smem>>
    %197 = vector.broadcast %196 : f32 to vector<2x2x128xf32>
    %198 = arith.mulf %13, %197 : vector<2x2x128xf32>
    %199 = arith.addf %195, %198 : vector<2x2x128xf32>
    %c18_37 = arith.constant 18 : index
    %200 = memref.load %arg3[%c18_37] : memref<32xf32, #tpu.memory_space<smem>>
    %201 = vector.broadcast %200 : f32 to vector<2x2x128xf32>
    %202 = arith.mulf %15, %201 : vector<2x2x128xf32>
    %203 = arith.addf %199, %202 : vector<2x2x128xf32>
    %c19_38 = arith.constant 19 : index
    %204 = memref.load %arg3[%c19_38] : memref<32xf32, #tpu.memory_space<smem>>
    %205 = vector.broadcast %204 : f32 to vector<2x2x128xf32>
    %206 = arith.mulf %17, %205 : vector<2x2x128xf32>
    %207 = arith.addf %203, %206 : vector<2x2x128xf32>
    %c4_39 = arith.constant 4 : index
    %208 = memref.load %arg4[%c4_39] : memref<8xf32, #tpu.memory_space<smem>>
    %209 = vector.broadcast %208 : f32 to vector<2x2x128xf32>
    %210 = arith.addf %207, %209 : vector<2x2x128xf32>
    %cst_40 = arith.constant 0.000000e+00 : f32
    %211 = vector.broadcast %cst_40 : f32 to vector<2x2x128xf32>
    %212 = arith.maximumf %210, %211 : vector<2x2x128xf32>
    %c4_41 = arith.constant 4 : index
    %213 = memref.load %arg5[%c4_41] : memref<8xf32, #tpu.memory_space<smem>>
    %214 = vector.broadcast %213 : f32 to vector<2x2x128xf32>
    %215 = arith.mulf %212, %214 : vector<2x2x128xf32>
    %216 = arith.addf %176, %215 : vector<2x2x128xf32>
    %c20 = arith.constant 20 : index
    %217 = memref.load %arg2[%c20] : memref<32xf32, #tpu.memory_space<smem>>
    %218 = vector.broadcast %217 : f32 to vector<2x2x128xf32>
    %219 = arith.mulf %3, %218 : vector<2x2x128xf32>
    %c21 = arith.constant 21 : index
    %220 = memref.load %arg2[%c21] : memref<32xf32, #tpu.memory_space<smem>>
    %221 = vector.broadcast %220 : f32 to vector<2x2x128xf32>
    %222 = arith.mulf %5, %221 : vector<2x2x128xf32>
    %223 = arith.addf %219, %222 : vector<2x2x128xf32>
    %c22 = arith.constant 22 : index
    %224 = memref.load %arg2[%c22] : memref<32xf32, #tpu.memory_space<smem>>
    %225 = vector.broadcast %224 : f32 to vector<2x2x128xf32>
    %226 = arith.mulf %7, %225 : vector<2x2x128xf32>
    %227 = arith.addf %223, %226 : vector<2x2x128xf32>
    %c23 = arith.constant 23 : index
    %228 = memref.load %arg2[%c23] : memref<32xf32, #tpu.memory_space<smem>>
    %229 = vector.broadcast %228 : f32 to vector<2x2x128xf32>
    %230 = arith.mulf %9, %229 : vector<2x2x128xf32>
    %231 = arith.addf %227, %230 : vector<2x2x128xf32>
    %c20_42 = arith.constant 20 : index
    %232 = memref.load %arg3[%c20_42] : memref<32xf32, #tpu.memory_space<smem>>
    %233 = vector.broadcast %232 : f32 to vector<2x2x128xf32>
    %234 = arith.mulf %11, %233 : vector<2x2x128xf32>
    %235 = arith.addf %231, %234 : vector<2x2x128xf32>
    %c21_43 = arith.constant 21 : index
    %236 = memref.load %arg3[%c21_43] : memref<32xf32, #tpu.memory_space<smem>>
    %237 = vector.broadcast %236 : f32 to vector<2x2x128xf32>
    %238 = arith.mulf %13, %237 : vector<2x2x128xf32>
    %239 = arith.addf %235, %238 : vector<2x2x128xf32>
    %c22_44 = arith.constant 22 : index
    %240 = memref.load %arg3[%c22_44] : memref<32xf32, #tpu.memory_space<smem>>
    %241 = vector.broadcast %240 : f32 to vector<2x2x128xf32>
    %242 = arith.mulf %15, %241 : vector<2x2x128xf32>
    %243 = arith.addf %239, %242 : vector<2x2x128xf32>
    %c23_45 = arith.constant 23 : index
    %244 = memref.load %arg3[%c23_45] : memref<32xf32, #tpu.memory_space<smem>>
    %245 = vector.broadcast %244 : f32 to vector<2x2x128xf32>
    %246 = arith.mulf %17, %245 : vector<2x2x128xf32>
    %247 = arith.addf %243, %246 : vector<2x2x128xf32>
    %c5_46 = arith.constant 5 : index
    %248 = memref.load %arg4[%c5_46] : memref<8xf32, #tpu.memory_space<smem>>
    %249 = vector.broadcast %248 : f32 to vector<2x2x128xf32>
    %250 = arith.addf %247, %249 : vector<2x2x128xf32>
    %cst_47 = arith.constant 0.000000e+00 : f32
    %251 = vector.broadcast %cst_47 : f32 to vector<2x2x128xf32>
    %252 = arith.maximumf %250, %251 : vector<2x2x128xf32>
    %c5_48 = arith.constant 5 : index
    %253 = memref.load %arg5[%c5_48] : memref<8xf32, #tpu.memory_space<smem>>
    %254 = vector.broadcast %253 : f32 to vector<2x2x128xf32>
    %255 = arith.mulf %252, %254 : vector<2x2x128xf32>
    %256 = arith.addf %216, %255 : vector<2x2x128xf32>
    %c24 = arith.constant 24 : index
    %257 = memref.load %arg2[%c24] : memref<32xf32, #tpu.memory_space<smem>>
    %258 = vector.broadcast %257 : f32 to vector<2x2x128xf32>
    %259 = arith.mulf %3, %258 : vector<2x2x128xf32>
    %c25 = arith.constant 25 : index
    %260 = memref.load %arg2[%c25] : memref<32xf32, #tpu.memory_space<smem>>
    %261 = vector.broadcast %260 : f32 to vector<2x2x128xf32>
    %262 = arith.mulf %5, %261 : vector<2x2x128xf32>
    %263 = arith.addf %259, %262 : vector<2x2x128xf32>
    %c26 = arith.constant 26 : index
    %264 = memref.load %arg2[%c26] : memref<32xf32, #tpu.memory_space<smem>>
    %265 = vector.broadcast %264 : f32 to vector<2x2x128xf32>
    %266 = arith.mulf %7, %265 : vector<2x2x128xf32>
    %267 = arith.addf %263, %266 : vector<2x2x128xf32>
    %c27 = arith.constant 27 : index
    %268 = memref.load %arg2[%c27] : memref<32xf32, #tpu.memory_space<smem>>
    %269 = vector.broadcast %268 : f32 to vector<2x2x128xf32>
    %270 = arith.mulf %9, %269 : vector<2x2x128xf32>
    %271 = arith.addf %267, %270 : vector<2x2x128xf32>
    %c24_49 = arith.constant 24 : index
    %272 = memref.load %arg3[%c24_49] : memref<32xf32, #tpu.memory_space<smem>>
    %273 = vector.broadcast %272 : f32 to vector<2x2x128xf32>
    %274 = arith.mulf %11, %273 : vector<2x2x128xf32>
    %275 = arith.addf %271, %274 : vector<2x2x128xf32>
    %c25_50 = arith.constant 25 : index
    %276 = memref.load %arg3[%c25_50] : memref<32xf32, #tpu.memory_space<smem>>
    %277 = vector.broadcast %276 : f32 to vector<2x2x128xf32>
    %278 = arith.mulf %13, %277 : vector<2x2x128xf32>
    %279 = arith.addf %275, %278 : vector<2x2x128xf32>
    %c26_51 = arith.constant 26 : index
    %280 = memref.load %arg3[%c26_51] : memref<32xf32, #tpu.memory_space<smem>>
    %281 = vector.broadcast %280 : f32 to vector<2x2x128xf32>
    %282 = arith.mulf %15, %281 : vector<2x2x128xf32>
    %283 = arith.addf %279, %282 : vector<2x2x128xf32>
    %c27_52 = arith.constant 27 : index
    %284 = memref.load %arg3[%c27_52] : memref<32xf32, #tpu.memory_space<smem>>
    %285 = vector.broadcast %284 : f32 to vector<2x2x128xf32>
    %286 = arith.mulf %17, %285 : vector<2x2x128xf32>
    %287 = arith.addf %283, %286 : vector<2x2x128xf32>
    %c6_53 = arith.constant 6 : index
    %288 = memref.load %arg4[%c6_53] : memref<8xf32, #tpu.memory_space<smem>>
    %289 = vector.broadcast %288 : f32 to vector<2x2x128xf32>
    %290 = arith.addf %287, %289 : vector<2x2x128xf32>
    %cst_54 = arith.constant 0.000000e+00 : f32
    %291 = vector.broadcast %cst_54 : f32 to vector<2x2x128xf32>
    %292 = arith.maximumf %290, %291 : vector<2x2x128xf32>
    %c6_55 = arith.constant 6 : index
    %293 = memref.load %arg5[%c6_55] : memref<8xf32, #tpu.memory_space<smem>>
    %294 = vector.broadcast %293 : f32 to vector<2x2x128xf32>
    %295 = arith.mulf %292, %294 : vector<2x2x128xf32>
    %296 = arith.addf %256, %295 : vector<2x2x128xf32>
    %c28 = arith.constant 28 : index
    %297 = memref.load %arg2[%c28] : memref<32xf32, #tpu.memory_space<smem>>
    %298 = vector.broadcast %297 : f32 to vector<2x2x128xf32>
    %299 = arith.mulf %3, %298 : vector<2x2x128xf32>
    %c29 = arith.constant 29 : index
    %300 = memref.load %arg2[%c29] : memref<32xf32, #tpu.memory_space<smem>>
    %301 = vector.broadcast %300 : f32 to vector<2x2x128xf32>
    %302 = arith.mulf %5, %301 : vector<2x2x128xf32>
    %303 = arith.addf %299, %302 : vector<2x2x128xf32>
    %c30 = arith.constant 30 : index
    %304 = memref.load %arg2[%c30] : memref<32xf32, #tpu.memory_space<smem>>
    %305 = vector.broadcast %304 : f32 to vector<2x2x128xf32>
    %306 = arith.mulf %7, %305 : vector<2x2x128xf32>
    %307 = arith.addf %303, %306 : vector<2x2x128xf32>
    %c31 = arith.constant 31 : index
    %308 = memref.load %arg2[%c31] : memref<32xf32, #tpu.memory_space<smem>>
    %309 = vector.broadcast %308 : f32 to vector<2x2x128xf32>
    %310 = arith.mulf %9, %309 : vector<2x2x128xf32>
    %311 = arith.addf %307, %310 : vector<2x2x128xf32>
    %c28_56 = arith.constant 28 : index
    %312 = memref.load %arg3[%c28_56] : memref<32xf32, #tpu.memory_space<smem>>
    %313 = vector.broadcast %312 : f32 to vector<2x2x128xf32>
    %314 = arith.mulf %11, %313 : vector<2x2x128xf32>
    %315 = arith.addf %311, %314 : vector<2x2x128xf32>
    %c29_57 = arith.constant 29 : index
    %316 = memref.load %arg3[%c29_57] : memref<32xf32, #tpu.memory_space<smem>>
    %317 = vector.broadcast %316 : f32 to vector<2x2x128xf32>
    %318 = arith.mulf %13, %317 : vector<2x2x128xf32>
    %319 = arith.addf %315, %318 : vector<2x2x128xf32>
    %c30_58 = arith.constant 30 : index
    %320 = memref.load %arg3[%c30_58] : memref<32xf32, #tpu.memory_space<smem>>
    %321 = vector.broadcast %320 : f32 to vector<2x2x128xf32>
    %322 = arith.mulf %15, %321 : vector<2x2x128xf32>
    %323 = arith.addf %319, %322 : vector<2x2x128xf32>
    %c31_59 = arith.constant 31 : index
    %324 = memref.load %arg3[%c31_59] : memref<32xf32, #tpu.memory_space<smem>>
    %325 = vector.broadcast %324 : f32 to vector<2x2x128xf32>
    %326 = arith.mulf %17, %325 : vector<2x2x128xf32>
    %327 = arith.addf %323, %326 : vector<2x2x128xf32>
    %c7_60 = arith.constant 7 : index
    %328 = memref.load %arg4[%c7_60] : memref<8xf32, #tpu.memory_space<smem>>
    %329 = vector.broadcast %328 : f32 to vector<2x2x128xf32>
    %330 = arith.addf %327, %329 : vector<2x2x128xf32>
    %cst_61 = arith.constant 0.000000e+00 : f32
    %331 = vector.broadcast %cst_61 : f32 to vector<2x2x128xf32>
    %332 = arith.maximumf %330, %331 : vector<2x2x128xf32>
    %c7_62 = arith.constant 7 : index
    %333 = memref.load %arg5[%c7_62] : memref<8xf32, #tpu.memory_space<smem>>
    %334 = vector.broadcast %333 : f32 to vector<2x2x128xf32>
    %335 = arith.mulf %332, %334 : vector<2x2x128xf32>
    %336 = arith.addf %296, %335 : vector<2x2x128xf32>
    %c0_63 = arith.constant 0 : index
    %337 = memref.load %arg6[%c0_63] : memref<1xf32, #tpu.memory_space<smem>>
    %338 = vector.broadcast %337 : f32 to vector<2x2x128xf32>
    %339 = arith.addf %336, %338 : vector<2x2x128xf32>
    %340 = arith.negf %339 : vector<2x2x128xf32>
    %341 = math.exp %340 : vector<2x2x128xf32>
    %cst_64 = arith.constant 1.000000e+00 : f32
    %342 = vector.broadcast %cst_64 : f32 to vector<2x2x128xf32>
    %343 = arith.addf %342, %341 : vector<2x2x128xf32>
    %344 = arith.divf %342, %343 : vector<2x2x128xf32>
    %345 = arith.mulf %11, %344 : vector<2x2x128xf32>
    %c0_65 = arith.constant 0 : index
    %c0_66 = arith.constant 0 : index
    %c0_67 = arith.constant 0 : index
    %c0_68 = arith.constant 0 : index
    %346 = vector.load %arg9[%c0_65, %c0_66, %c0_67, %c0_68] : memref<2x4x2x128xf32, #tpu.memory_space<vmem>>, vector<2x1x2x128xf32>
    %347 = vector.shape_cast %346 : vector<2x1x2x128xf32> to vector<2x2x128xf32>
    %348 = vector.shape_cast %345 : vector<2x2x128xf32> to vector<2x1x2x128xf32>
    tpu.vector_store %arg9[%c0_65, %c0_66, %c0_67, %c0_68], %348 {strides = array<i32>} : memref<2x4x2x128xf32, #tpu.memory_space<vmem>>, vector<2x1x2x128xf32>,
    %349 = arith.mulf %13, %344 : vector<2x2x128xf32>
    %c0_69 = arith.constant 0 : index
    %c1_70 = arith.constant 1 : index
    %c0_71 = arith.constant 0 : index
    %c0_72 = arith.constant 0 : index
    %350 = vector.load %arg9[%c0_69, %c1_70, %c0_71, %c0_72] : memref<2x4x2x128xf32, #tpu.memory_space<vmem>>, vector<2x1x2x128xf32>
    %351 = vector.shape_cast %350 : vector<2x1x2x128xf32> to vector<2x2x128xf32>
    %352 = vector.shape_cast %349 : vector<2x2x128xf32> to vector<2x1x2x128xf32>
    tpu.vector_store %arg9[%c0_69, %c1_70, %c0_71, %c0_72], %352 {strides = array<i32>} : memref<2x4x2x128xf32, #tpu.memory_space<vmem>>, vector<2x1x2x128xf32>,
    %353 = arith.mulf %15, %344 : vector<2x2x128xf32>
    %c0_73 = arith.constant 0 : index
    %c2_74 = arith.constant 2 : index
    %c0_75 = arith.constant 0 : index
    %c0_76 = arith.constant 0 : index
    %354 = vector.load %arg9[%c0_73, %c2_74, %c0_75, %c0_76] : memref<2x4x2x128xf32, #tpu.memory_space<vmem>>, vector<2x1x2x128xf32>
    %355 = vector.shape_cast %354 : vector<2x1x2x128xf32> to vector<2x2x128xf32>
    %356 = vector.shape_cast %353 : vector<2x2x128xf32> to vector<2x1x2x128xf32>
    tpu.vector_store %arg9[%c0_73, %c2_74, %c0_75, %c0_76], %356 {strides = array<i32>} : memref<2x4x2x128xf32, #tpu.memory_space<vmem>>, vector<2x1x2x128xf32>,
    %357 = arith.mulf %17, %344 : vector<2x2x128xf32>
    %c0_77 = arith.constant 0 : index
    %c3_78 = arith.constant 3 : index
    %c0_79 = arith.constant 0 : index
    %c0_80 = arith.constant 0 : index
    %358 = vector.load %arg9[%c0_77, %c3_78, %c0_79, %c0_80] : memref<2x4x2x128xf32, #tpu.memory_space<vmem>>, vector<2x1x2x128xf32>
    %359 = vector.shape_cast %358 : vector<2x1x2x128xf32> to vector<2x2x128xf32>
    %360 = vector.shape_cast %357 : vector<2x2x128xf32> to vector<2x1x2x128xf32>
    tpu.vector_store %arg9[%c0_77, %c3_78, %c0_79, %c0_80], %360 {strides = array<i32>} : memref<2x4x2x128xf32, #tpu.memory_space<vmem>>, vector<2x1x2x128xf32>,
    return
  }
  func.func @transform_0(%arg0: i32, %arg1: i32) -> i32 {
    %c0_i32 = arith.constant 0 : i32
    %c0_i32_0 = arith.constant 0 : i32
    return %c0_i32 : i32
  }
  func.func @transform_1(%arg0: i32, %arg1: i32) -> i32 {
    %c0_i32 = arith.constant 0 : i32
    %c0_i32_0 = arith.constant 0 : i32
    return %c0_i32 : i32
  }
  func.func @transform_2(%arg0: i32, %arg1: i32) -> i32 {
    %c0_i32 = arith.constant 0 : i32
    %c0_i32_0 = arith.constant 0 : i32
    return %c0_i32 : i32
  }
  func.func @transform_3(%arg0: i32, %arg1: i32) -> i32 {
    %c0_i32 = arith.constant 0 : i32
    %c0_i32_0 = arith.constant 0 : i32
    return %c0_i32 : i32
  }
  func.func @transform_4(%arg0: i32, %arg1: i32) -> i32 {
    %c0_i32 = arith.constant 0 : i32
    %c0_i32_0 = arith.constant 0 : i32
    return %c0_i32 : i32
  }
  func.func @transform_5(%arg0: i32, %arg1: i32) -> (i32, i32, i32, i32) {
    %c0_i32 = arith.constant 0 : i32
    %c0_i32_0 = arith.constant 0 : i32
    %c0_i32_1 = arith.constant 0 : i32
    return %arg0, %c0_i32, %arg1, %c0_i32_0 : i32, i32, i32, i32
  }
  func.func @transform_6(%arg0: i32, %arg1: i32) -> (i32, i32, i32, i32) {
    %c0_i32 = arith.constant 0 : i32
    %c0_i32_0 = arith.constant 0 : i32
    %c0_i32_1 = arith.constant 0 : i32
    return %arg0, %c0_i32, %arg1, %c0_i32_0 : i32, i32, i32, i32
  }
  func.func @transform_7(%arg0: i32, %arg1: i32) -> (i32, i32, i32, i32) {
    %c0_i32 = arith.constant 0 : i32
    %c0_i32_0 = arith.constant 0 : i32
    %c0_i32_1 = arith.constant 0 : i32
    return %arg0, %c0_i32, %arg1, %c0_i32_0 : i32, i32, i32, i32
  }
}

</mosaic_0001>

<bundles_post_ra>
// kernel: attention_block_pallas.1
= control target key start
LH: loop header
LB: loop body
LE: loop exit
PB: predicated region body
PF: predicated region fallthrough
CT: control target
= control target key end

     0   :  { %13 = vsyncpa [#allocation4], 0  ;;  %s1320_s0 = inlined_call_operand.vmem [shape: f32[32], index: 0, kind: input, shape index: {}]   ;;  %s1321_s1 = inlined_call_operand.vmem [shape: f32[32], index: 1, kind: input, shape index: {}]   ;;  %s1322_s2 = inlined_call_operand.vmem [shape: f32[8], index: 2, kind: input, shape index: {}]   ;;  %s1323_s3 = inlined_call_operand.vmem [shape: f32[8], index: 3, kind: input, shape index: {}]   ;;  %s1324_s4 = inlined_call_operand.<no memory space> [shape: f32[1], index: 4, kind: input, shape index: {}]   ;;  %s1325_s5 = inlined_call_operand.vmem [shape: f32[2,4,2,128], index: 5, kind: input, shape index: {}]   ;;  %s1326_s6 = inlined_call_operand.vmem [shape: f32[2,4,2,128], index: 6, kind: input, shape index: {}]   ;;  %s1327_s7 = inlined_call_operand.vmem [shape: f32[2,4,2,128], index: 7, kind: output, shape index: {}]  }
   0x1   :  { %14 = vsyncpa [#allocation6], 0  ;;  %s30_s26 = sshll.u32 %s1321_s1, 4  ;;  %s31_s26 = int_to_ptr.vmem [resolvable:$true] %s30_s26 }
   0x2   :  { %15 = vsyncpa [#allocation9], 0  ;;  %s21_s29 = sshll.u32 %s1320_s0, 4  ;;  %s771_s30 = smov [#allocation5]   ;;  %s22_s29 = int_to_ptr.vmem [resolvable:$true] %s21_s29 }
   0x3   :  { %33 = dma.vmem_to_smem %s31_s26, 16, %s771_s30, [#allocation6]  }
   0x4   :  { %s772_s8 = smov [#allocation3]   ;;  %s39_s11 = sshll.u32 %s1322_s2, 4  ;;  %s40_s11 = int_to_ptr.vmem [resolvable:$true] %s39_s11 }
   0x5   :  { %24 = dma.vmem_to_smem %s22_s29, 16, %s772_s8, [#allocation4]  }
   0x6   :  { %s48_s1 = sshll.u32 %s1323_s3, 4  ;;  %s773_s14 = smov [#allocation7]   ;;  %s49_s1 = int_to_ptr.vmem [resolvable:$true] %s48_s1 }
   0x7   :  { %42 = dma.vmem_to_smem %s40_s11, 16, %s773_s14, [#allocation6]  }
   0x8   :  { %s774_s15 = smov [#allocation8]  }
   0x9   :  { %51 = dma.vmem_to_smem %s49_s1, 16, %s774_s15, [#allocation9]  }
   0xa   :  { %765 = dma.done.wait [#allocation4], 16  }
   0xb   :  { %766 = vsyncadd [#allocation4], 4294967280 }
   0xc   :  { %767 = dma.done.wait [#allocation6], 32  }
   0xd   :  { %768 = vsyncadd [#allocation6], 4294967264 }
   0xe   :  { %769 = dma.done.wait [#allocation9], 16  }
   0xf   :  { %770 = vsyncadd [#allocation9], 4294967280 }
  0x10   :  { %74 = sfence }
  0x11   :  { %s91_s0 = sld [smem:[#allocation3]]  ;;  %v830_v0 = vld [vmem:[%s1325_s5] sm:$0x3]  ;;  %v835_v1 = vld [vmem:[%s1325_s5 + $0x8] sm:$0x3] }
  0x12   :  { %s621_s16 = sld [smem:[#allocation3 + $0x1]]  ;;  %v842_v2 = vld [vmem:[%s1325_s5 + $0x2] sm:$0x3]  ;;  %v847_v3 = vld [vmem:[%s1325_s5 + $0xa] sm:$0x3] }
  0x13   :  { %s622_s2 = sld [smem:[#allocation3 + $0x2]]  ;;  %v854_v4 = vld [vmem:[%s1325_s5 + $0x4] sm:$0x3]  ;;  %v859_v5 = vld [vmem:[%s1325_s5 + $0xc] sm:$0x3] }
  0x14   :  { %s623_s17 = sld [smem:[#allocation3 + $0x3]]  ;;  %v866_v7 = vld [vmem:[%s1325_s5 + $0x6] sm:$0x3]  ;;  %v871_v8 = vld [vmem:[%s1325_s5 + $0xe] sm:$0x3] }
  0x15   :  { %s837_s21 = sld [smem:[#allocation5]]  ;;  %v882_v15 = vld [vmem:[%s1326_s6] sm:$0x3]  ;;  %v887_v16 = vld [vmem:[%s1326_s6 + $0x8] sm:$0x3] }
  0x16   :  { %s849_s26 = sld [smem:[#allocation5 + $0x1]]  ;;  %v900_v24 = vld [vmem:[%s1326_s6 + $0x2] sm:$0x3]  ;;  %v905_v25 = vld [vmem:[%s1326_s6 + $0xa] sm:$0x3] }
  0x17   :  { %v92_v6 = vstv %s91_s0  ;;  %s861_s8 = sld [smem:[#allocation5 + $0x2]]  ;;  %v914_v28 = vld [vmem:[%s1326_s6 + $0x4] sm:$0x3]  ;;  %v923_v33 = vld [vmem:[%s1326_s6 + $0xc] sm:$0x3] }
  0x18   :  { %v93_v9 = vmul.f32 %v92_v6, %v830_v0  ;;  %v94_v10 = vmul.f32 %v92_v6, %v835_v1  ;;  %v96_v11 = vstv %s621_s16  ;;  %s875_s13 = sld [smem:[#allocation5 + $0x3]]  ;;  %v939_v41 = vld [vmem:[%s1326_s6 + $0x6] sm:$0x3]  ;;  %v944_v42 = vld [vmem:[%s1326_s6 + $0xe] sm:$0x3] }
  0x19   :  { %v97_v12 = vmul.f32 %v96_v11, %v842_v2  ;;  %v98_v13 = vmul.f32 %v96_v11, %v847_v3  ;;  %v102_v14 = vstv %s622_s2  ;;  %s891_s0 = sld [smem:[#allocation7]] }
  0x1a   :  { %v103_v17 = vmul.f32 %v102_v14, %v854_v4  ;;  %v104_v18 = vmul.f32 %v102_v14, %v859_v5  ;;  %v108_v19 = vstv %s623_s17  ;;  %s895_s16 = sld [smem:[#allocation3 + $0x4]] }
  0x1b   :  { %v99_v20 = vadd.f32 %v97_v12, %v93_v9  ;;  %v100_v21 = vadd.f32 %v98_v13, %v94_v10  ;;  %v109_v22 = vmul.f32 %v108_v19, %v866_v7  ;;  %v110_v23 = vmul.f32 %v108_v19, %v871_v8  ;;  %s909_s17 = sld [smem:[#allocation3 + $0x5]] }
  0x1c   :  { %v114_v26 = vstv %s837_s21  ;;  %v120_v27 = vstv %s849_s26  ;;  %s918_s23 = sld [smem:[#allocation3 + $0x6]] }
  0x1d   :  { %v105_v29 = vadd.f32 %v103_v17, %v99_v20  ;;  %v106_v30 = vadd.f32 %v104_v18, %v100_v21  ;;  %v115_v31 = vmul.f32 %v114_v26, %v882_v15  ;;  %v116_v32 = vmul.f32 %v114_v26, %v887_v16  ;;  %s926_s21 = sld [smem:[#allocation3 + $0x7]] }
  0x1e   :  { %v126_v34 = vstv %s861_s8  ;;  %v121_v37 = vmul.f32 %v120_v27, %v900_v24  ;;  %v122_v38 = vmul.f32 %v120_v27, %v905_v25  ;;  %s930_s26 = sld [smem:[#allocation5 + $0x4]]  ;;  %v132_v40 = vstv %s875_s13 }
  0x1f   :  { %v111_v35 = vadd.f32 %v109_v22, %v105_v29  ;;  %v112_v36 = vadd.f32 %v110_v23, %v106_v30  ;;  %v127_v39 = vmul.f32 %v126_v34, %v914_v28  ;;  %s934_s27 = sld [smem:[#allocation5 + $0x5]]  ;;  %v128_v45 = vmul.f32 %v126_v34, %v923_v33 }
  0x20   :  { %v148_v46 = vstv %s895_s16  ;;  %s948_s9 = sld [smem:[#allocation5 + $0x6]]  ;;  %v133_v54 = vmul.f32 %v132_v40, %v939_v41  ;;  %v134_v55 = vmul.f32 %v132_v40, %v944_v42  ;;  %v138_v10 = vstv %s891_s0 }
  0x21   :  { %v117_v43 = vadd.f32 %v115_v31, %v111_v35  ;;  %v118_v44 = vadd.f32 %v116_v32, %v112_v36  ;;  %v149_v47 = vmul.f32 %v148_v46, %v830_v0  ;;  %v150_v48 = vmul.f32 %v148_v46, %v835_v1  ;;  %s953_s10 = sld [smem:[#allocation5 + $0x7]] }
  0x22   :  { %v152_v49 = vstv %s909_s17  ;;  %s955_s6 = sld [smem:[#allocation8]]  ;;  %v158_v56 = vstv %s918_s23 }
  0x23   :  { %v123_v50 = vadd.f32 %v121_v37, %v117_v43  ;;  %v124_v51 = vadd.f32 %v122_v38, %v118_v44  ;;  %v153_v52 = vmul.f32 %v152_v49, %v842_v2  ;;  %v154_v53 = vmul.f32 %v152_v49, %v847_v3  ;;  %s963_s11 = sld [smem:[#allocation3 + $0x8]] }
  0x24   :  { %v164_v57 = vstv %s926_s21  ;;  %v159_v62 = vmul.f32 %v158_v56, %v854_v4  ;;  %v160_v63 = vmul.f32 %v158_v56, %v859_v5  ;;  %s969_s12 = sld [smem:[#allocation3 + $0x9]]  ;;  %v170_v11 = vstv %s930_s26 }
  0x25   :  { %v129_v58 = vadd.f32 %v127_v39, %v123_v50  ;;  %v130_v59 = vadd.f32 %v128_v45, %v124_v51  ;;  %v155_v60 = vadd.f32 %v153_v52, %v149_v47  ;;  %v156_v61 = vadd.f32 %v154_v53, %v150_v48  ;;  %s974_s13 = sld [smem:[#allocation3 + $0xa]] }
  0x26   :  { %v165_v6 = vmul.f32 %v164_v57, %v866_v7  ;;  %v166_v9 = vmul.f32 %v164_v57, %v871_v8  ;;  %v176_v12 = vstv %s934_s27  ;;  %v171_v17 = vmul.f32 %v170_v11, %v882_v15  ;;  %s978_s1 = sld [smem:[#allocation3 + $0xb]] }
  0x27   :  { %v161_v13 = vadd.f32 %v159_v62, %v155_v60  ;;  %v162_v14 = vadd.f32 %v160_v63, %v156_v61  ;;  %v172_v18 = vmul.f32 %v170_v11, %v887_v16  ;;  %v135_v19 = vadd.f32 %v133_v54, %v129_v58  ;;  %s982_s14 = sld [smem:[#allocation7 + $0x1]] }
  0x28   :  { %v136_v20 = vadd.f32 %v134_v55, %v130_v59  ;;  %v177_v21 = vmul.f32 %v176_v12, %v900_v24  ;;  %v178_v22 = vmul.f32 %v176_v12, %v905_v25  ;;  %v182_v27 = vstv %s948_s9  ;;  %s986_s5 = sld [smem:[#allocation5 + $0x8]] }
  0x29   :  { %v167_v23 = vadd.f32 %v165_v6, %v161_v13  ;;  %v168_v26 = vadd.f32 %v166_v9, %v162_v14  ;;  %v188_v29 = vstv %s953_s10  ;;  %v144_v30 = vstv %s955_s6  ;;  %s989_s15 = sld [smem:[#allocation5 + $0x9]] }
  0x2a   :  { %v183_v34 = vmul.f32 %v182_v27, %v914_v28  ;;  %v184_v35 = vmul.f32 %v182_v27, %v923_v33  ;;  %v139_v36 = vadd.f32 %v138_v10, %v135_v19  ;;  %v993_v37 = vadd.f32 %v138_v10, %v136_v20  ;;  %s997_s0 = sld [smem:[#allocation5 + $0xa]] }
  0x2b   :  { %v173_v31 = vadd.f32 %v171_v17, %v167_v23  ;;  %v174_v32 = vadd.f32 %v172_v18, %v168_v26  ;;  %v189_v38 = vmul.f32 %v188_v29, %v939_v41  ;;  %v190_v39 = vmul.f32 %v188_v29, %v944_v42  ;;  %s1001_s16 = sld [smem:[#allocation5 + $0xb]] }
  0x2c   :  { %v206_v44 = vstv %s963_s11  ;;  %v210_v45 = vstv %s969_s12  ;;  %s1003_s2 = sld [smem:[#allocation8 + $0x1]]  ;;  %v216_v52 = vstv %s974_s13  ;;  %v222_v53 = vstv %s978_s1 }
  0x2d   :  { %v179_v40 = vadd.f32 %v177_v21, %v173_v31  ;;  %v180_v43 = vadd.f32 %v178_v22, %v174_v32  ;;  %v207_v46 = vmul.f32 %v206_v44, %v830_v0  ;;  %v208_v47 = vmul.f32 %v206_v44, %v835_v1  ;;  %s1011_s18 = sld [smem:[#allocation7 + $0x2]] }
  0x2e   :  { %v211_v48 = vmul.f32 %v210_v45, %v842_v2  ;;  %v212_v49 = vmul.f32 %v210_v45, %v847_v3  ;;  %v217_v56 = vmul.f32 %v216_v52, %v854_v4  ;;  %v218_v57 = vmul.f32 %v216_v52, %v859_v5  ;;  %s1015_s19 = sld [smem:[#allocation3 + $0xc]] }
  0x2f   :  { %v185_v50 = vadd.f32 %v183_v34, %v179_v40  ;;  %v186_v51 = vadd.f32 %v184_v35, %v180_v43  ;;  %v194_v59 = vstv %s982_s14  ;;  %v223_v60 = vmul.f32 %v222_v53, %v866_v7  ;;  %s1020_s3 = sld [smem:[#allocation3 + $0xd]] }
  0x30   :  { %v213_v54 = vadd.f32 %v211_v48, %v207_v46  ;;  %v214_v55 = vadd.f32 %v212_v49, %v208_v47  ;;  %v224_v61 = vmul.f32 %v222_v53, %v871_v8  ;;  %v228_v6 = vstv %s986_s5  ;;  %s1024_s17 = sld [smem:[#allocation3 + $0xe]] }
  0x31   :  { %v191_v58 = vadd.f32 %v189_v38, %v185_v50  ;;  %v234_v9 = vstv %s989_s15  ;;  %v141_v10 = vmax.f32 %v139_v36, 0.0  ;;  %v192_v11 = vadd.f32 %v190_v39, %v186_v51  ;;  %s1028_s20 = sld [smem:[#allocation3 + $0xf]] }
  0x32   :  { %v219_v62 = vadd.f32 %v217_v56, %v213_v54  ;;  %v220_v63 = vadd.f32 %v218_v57, %v214_v55  ;;  %v229_v12 = vmul.f32 %v228_v6, %v882_v15  ;;  %v230_v13 = vmul.f32 %v228_v6, %v887_v16  ;;  %s1034_s22 = sld [smem:[#allocation5 + $0xc]] }
  0x33   :  { %v235_v18 = vmul.f32 %v234_v9, %v900_v24  ;;  %v236_v19 = vmul.f32 %v234_v9, %v905_v25  ;;  %v195_v20 = vadd.f32 %v194_v59, %v191_v58  ;;  %v240_v21 = vstv %s997_s0  ;;  %s1038_s23 = sld [smem:[#allocation5 + $0xd]] }
  0x34   :  { %v225_v14 = vadd.f32 %v223_v60, %v219_v62  ;;  %v226_v17 = vadd.f32 %v224_v61, %v220_v63  ;;  %v246_v22 = vstv %s1001_s16  ;;  %v241_v27 = vmul.f32 %v240_v21, %v914_v28  ;;  %s1049_s24 = sld [smem:[#allocation5 + $0xe]] }
  0x35   :  { %v242_v29 = vmul.f32 %v240_v21, %v923_v33  ;;  %v142_v31 = vmax.f32 %v993_v37, 0.0  ;;  %v145_v32 = vmul.f32 %v144_v30, %v141_v10  ;;  %v196_v34 = vadd.f32 %v194_v59, %v192_v11  ;;  %s1051_s25 = sld [smem:[#allocation8 + $0x2]] }
  0x36   :  { %v231_v23 = vadd.f32 %v229_v12, %v225_v14  ;;  %v232_v26 = vadd.f32 %v230_v13, %v226_v17  ;;  %v200_v35 = vstv %s1003_s2  ;;  %v247_v39 = vmul.f32 %v246_v22, %v939_v41  ;;  %s1059_s21 = sld [smem:[#allocation5 + $0xf]] }
  0x37   :  { %v248_v40 = vmul.f32 %v246_v22, %v944_v42  ;;  %v197_v43 = vmax.f32 %v195_v20, 0.0  ;;  %v252_v44 = vstv %s1011_s18  ;;  %v264_v45 = vstv %s1015_s19  ;;  %s1063_s26 = sld [smem:[#allocation3 + $0x10]] }
  0x38   :  { %v237_v36 = vadd.f32 %v235_v18, %v231_v23  ;;  %v238_v38 = vadd.f32 %v236_v19, %v232_v26  ;;  %v268_v46 = vstv %s1020_s3  ;;  %v265_v48 = vmul.f32 %v264_v45, %v830_v0  ;;  %s1067_s27 = sld [smem:[#allocation3 + $0x11]] }
  0x39   :  { %v266_v49 = vmul.f32 %v264_v45, %v835_v1  ;;  %v269_v50 = vmul.f32 %v268_v46, %v842_v2  ;;  %v270_v51 = vmul.f32 %v268_v46, %v847_v3  ;;  %v274_v52 = vstv %s1024_s17  ;;  %s1071_s28 = sld [smem:[#allocation3 + $0x12]] }
  0x3a   :  { %v243_v47 = vadd.f32 %v241_v27, %v237_v36  ;;  %v244_v37 = vadd.f32 %v242_v29, %v238_v38  ;;  %v280_v53 = vstv %s1028_s20  ;;  %v275_v56 = vmul.f32 %v274_v52, %v854_v4  ;;  %s1075_s29 = sld [smem:[#allocation3 + $0x13]] }
  0x3b   :  { %v276_v57 = vmul.f32 %v274_v52, %v859_v5  ;;  %v271_v58 = vadd.f32 %v269_v50, %v265_v48  ;;  %v272_v59 = vadd.f32 %v270_v51, %v266_v49  ;;  %v281_v60 = vmul.f32 %v280_v53, %v866_v7  ;;  %s1084_s30 = sld [smem:[#allocation5 + $0x10]] }
  0x3c   :  { %v249_v54 = vadd.f32 %v247_v39, %v243_v47  ;;  %v250_v55 = vadd.f32 %v248_v40, %v244_v37  ;;  %v282_v61 = vmul.f32 %v280_v53, %v871_v8  ;;  %v198_v62 = vmax.f32 %v196_v34, 0.0  ;;  %s1089_s8 = sld [smem:[#allocation5 + $0x11]] }
  0x3d   :  { %v201_v63 = vmul.f32 %v200_v35, %v197_v43  ;;  %v286_v6 = vstv %s1034_s22  ;;  %v292_v9 = vstv %s1038_s23  ;;  %v277_v10 = vadd.f32 %v275_v56, %v271_v58  ;;  %s1094_s9 = sld [smem:[#allocation7 + $0x3]] }
  0x3e   :  { %v278_v11 = vadd.f32 %v276_v57, %v272_v59  ;;  %v287_v12 = vmul.f32 %v286_v6, %v882_v15  ;;  %v288_v13 = vmul.f32 %v286_v6, %v887_v16  ;;  %v1077_v14 = vadd.f32 %v252_v44, %v249_v54  ;;  %s1100_s10 = sld [smem:[#allocation5 + $0x12]] }
  0x3f   :  { %v1079_v17 = vadd.f32 %v252_v44, %v250_v55  ;;  %v293_v18 = vmul.f32 %v292_v9, %v900_v24  ;;  %v283_v19 = vadd.f32 %v281_v60, %v277_v10  ;;  %v294_v21 = vmul.f32 %v292_v9, %v905_v25  ;;  %s1104_s6 = sld [smem:[#allocation5 + $0x13]] }
  0x40   :  { %v284_v20 = vadd.f32 %v282_v61, %v278_v11  ;;  %v298_v22 = vstv %s1049_s24  ;;  %v146_v23 = vmul.f32 %v144_v30, %v142_v31  ;;  %v202_v26 = vmul.f32 %v200_v35, %v198_v62  ;;  %s1106_s11 = sld [smem:[#allocation8 + $0x3]] }
  0x41   :  { %v258_v27 = vstv %s1051_s25  ;;  %v1091_v29 = vadd.f32 %v201_v63, %v145_v32  ;;  %v289_v34 = vadd.f32 %v287_v12, %v283_v19  ;;  %v299_v38 = vmul.f32 %v298_v22, %v914_v28  ;;  %s1115_s12 = sld [smem:[#allocation7 + $0x4]] }
  0x42   :  { %v290_v36 = vadd.f32 %v288_v13, %v284_v20  ;;  %v255_v39 = vmax.f32 %v1077_v14, 0.0  ;;  %v256_v40 = vmax.f32 %v1079_v17, 0.0  ;;  %v300_v30 = vmul.f32 %v298_v22, %v923_v33  ;;  %s1119_s13 = sld [smem:[#allocation3 + $0x14]] }
  0x43   :  { %v304_v31 = vstv %s1059_s21  ;;  %v295_v35 = vadd.f32 %v293_v18, %v289_v34  ;;  %v322_v43 = vstv %s1063_s26  ;;  %v326_v44 = vstv %s1067_s27  ;;  %s1124_s1 = sld [smem:[#allocation3 + $0x15]] }
  0x44   :  { %v296_v32 = vadd.f32 %v294_v21, %v290_v36  ;;  %v323_v45 = vmul.f32 %v322_v43, %v830_v0  ;;  %v324_v46 = vmul.f32 %v322_v43, %v835_v1  ;;  %v327_v47 = vmul.f32 %v326_v44, %v842_v2  ;;  %s1128_s14 = sld [smem:[#allocation3 + $0x16]] }
  0x45   :  { %v328_v37 = vmul.f32 %v326_v44, %v847_v3  ;;  %v301_v48 = vadd.f32 %v299_v38, %v295_v35  ;;  %v305_v49 = vmul.f32 %v304_v31, %v939_v41  ;;  %v332_v50 = vstv %s1071_s28  ;;  %s1133_s5 = sld [smem:[#allocation3 + $0x17]] }
  0x46   :  { %v338_v51 = vstv %s1075_s29  ;;  %v329_v52 = vadd.f32 %v327_v47, %v323_v45  ;;  %v333_v54 = vmul.f32 %v332_v50, %v854_v4  ;;  %v334_v55 = vmul.f32 %v332_v50, %v859_v5  ;;  %s1139_s15 = sld [smem:[#allocation5 + $0x14]] }
  0x47   :  { %v330_v53 = vadd.f32 %v328_v37, %v324_v46  ;;  %v302_v56 = vadd.f32 %v300_v30, %v296_v32  ;;  %v306_v57 = vmul.f32 %v304_v31, %v944_v42  ;;  %v339_v58 = vmul.f32 %v338_v51, %v866_v7  ;;  %s1143_s0 = sld [smem:[#allocation5 + $0x15]] }
  0x48   :  { %v340_v59 = vmul.f32 %v338_v51, %v871_v8  ;;  %v335_v60 = vadd.f32 %v333_v54, %v329_v52  ;;  %v344_v62 = vstv %s1084_s30  ;;  %v350_v63 = vstv %s1089_s8  ;;  %s1151_s16 = sld [smem:[#allocation5 + $0x16]] }
  0x49   :  { %v336_v61 = vadd.f32 %v334_v55, %v330_v53  ;;  %v307_v6 = vadd.f32 %v305_v49, %v301_v48  ;;  %v310_v9 = vstv %s1094_s9  ;;  %v345_v10 = vmul.f32 %v344_v62, %v882_v15  ;;  %s1153_s2 = sld [smem:[#allocation8 + $0x4]] }
  0x4a   :  { %v346_v11 = vmul.f32 %v344_v62, %v887_v16  ;;  %v341_v12 = vadd.f32 %v339_v58, %v335_v60  ;;  %v351_v14 = vmul.f32 %v350_v63, %v900_v24  ;;  %v352_v17 = vmul.f32 %v350_v63, %v905_v25  ;;  %s1161_s18 = sld [smem:[#allocation5 + $0x17]] }
  0x4b   :  { %v342_v13 = vadd.f32 %v340_v59, %v336_v61  ;;  %v204_v18 = vadd.f32 %v202_v26, %v146_v23  ;;  %v308_v19 = vadd.f32 %v306_v57, %v302_v56  ;;  %v356_v20 = vstv %s1100_s10  ;;  %s1165_s19 = sld [smem:[#allocation3 + $0x18]] }
  0x4c   :  { %v362_v21 = vstv %s1104_s6  ;;  %v347_v22 = vadd.f32 %v345_v10, %v341_v12  ;;  %v357_v36 = vmul.f32 %v356_v20, %v914_v28  ;;  %v358_v38 = vmul.f32 %v356_v20, %v923_v33  ;;  %s1169_s3 = sld [smem:[#allocation3 + $0x19]] }
  0x4d   :  { %v348_v34 = vadd.f32 %v346_v11, %v342_v13  ;;  %v259_v30 = vmul.f32 %v258_v27, %v255_v39  ;;  %v260_v31 = vmul.f32 %v258_v27, %v256_v40  ;;  %v311_v35 = vadd.f32 %v310_v9, %v307_v6  ;;  %s1173_s17 = sld [smem:[#allocation3 + $0x1a]] }
  0x4e   :  { %v316_v23 = vstv %s1106_s11  ;;  %v353_v26 = vadd.f32 %v351_v14, %v347_v22  ;;  %v363_v43 = vmul.f32 %v362_v21, %v939_v41  ;;  %v364_v44 = vmul.f32 %v362_v21, %v944_v42  ;;  %s1177_s20 = sld [smem:[#allocation3 + $0x1b]] }
  0x4f   :  { %v354_v32 = vadd.f32 %v352_v17, %v348_v34  ;;  %v312_v45 = vadd.f32 %v310_v9, %v308_v19  ;;  %v368_v46 = vstv %s1115_s12  ;;  %v380_v47 = vstv %s1119_s13  ;;  %s1186_s22 = sld [smem:[#allocation5 + $0x18]] }
  0x50   :  { %v384_v37 = vstv %s1124_s1  ;;  %v359_v48 = vadd.f32 %v357_v36, %v353_v26  ;;  %v381_v27 = vmul.f32 %v380_v47, %v830_v0  ;;  %v382_v39 = vmul.f32 %v380_v47, %v835_v1  ;;  %s1191_s23 = sld [smem:[#allocation5 + $0x19]] }
  0x51   :  { %v360_v49 = vadd.f32 %v358_v38, %v354_v32  ;;  %v385_v40 = vmul.f32 %v384_v37, %v842_v2  ;;  %v386_v50 = vmul.f32 %v384_v37, %v847_v3  ;;  %v390_v51 = vstv %s1128_s14  ;;  %s1195_s24 = sld [smem:[#allocation7 + $0x5]] }
  0x52   :  { %v396_v52 = vstv %s1133_s5  ;;  %v365_v53 = vadd.f32 %v363_v43, %v359_v48  ;;  %v391_v55 = vmul.f32 %v390_v51, %v854_v4  ;;  %v392_v56 = vmul.f32 %v390_v51, %v859_v5  ;;  %s1201_s25 = sld [smem:[#allocation5 + $0x1a]] }
  0x53   :  { %v366_v54 = vadd.f32 %v364_v44, %v360_v49  ;;  %v387_v57 = vadd.f32 %v385_v40, %v381_v27  ;;  %v388_v58 = vadd.f32 %v386_v50, %v382_v39  ;;  %v397_v59 = vmul.f32 %v396_v52, %v866_v7  ;;  %s1205_s21 = sld [smem:[#allocation5 + $0x1b]] }
  0x54   :  { %v398_v60 = vmul.f32 %v396_v52, %v871_v8  ;;  %v313_v61 = vmax.f32 %v311_v35, 0.0  ;;  %v314_v62 = vmax.f32 %v312_v45, 0.0  ;;  %v402_v63 = vstv %s1139_s15  ;;  %s1214_s26 = sld [smem:[#allocation7 + $0x6]] }
  0x55   :  { %v408_v6 = vstv %s1143_s0  ;;  %v393_v9 = vadd.f32 %v391_v55, %v387_v57  ;;  %v394_v10 = vadd.f32 %v392_v56, %v388_v58  ;;  %v403_v11 = vmul.f32 %v402_v63, %v882_v15  ;;  %s1218_s27 = sld [smem:[#allocation3 + $0x1c]] }
  0x56   :  { %v404_v12 = vmul.f32 %v402_v63, %v887_v16  ;;  %v1179_v13 = vadd.f32 %v368_v46, %v365_v53  ;;  %v1181_v14 = vadd.f32 %v368_v46, %v366_v54  ;;  %v409_v17 = vmul.f32 %v408_v6, %v900_v24  ;;  %s1223_s28 = sld [smem:[#allocation3 + $0x1d]] }
  0x57   :  { %v399_v19 = vadd.f32 %v397_v59, %v393_v9  ;;  %v400_v20 = vadd.f32 %v398_v60, %v394_v10  ;;  %v410_v21 = vmul.f32 %v408_v6, %v905_v25  ;;  %v414_v22 = vstv %s1151_s16  ;;  %s1227_s29 = sld [smem:[#allocation3 + $0x1e]] }
  0x58   :  { %v261_v34 = vadd.f32 %v259_v30, %v1091_v29  ;;  %v1189_v36 = vadd.f32 %v260_v31, %v204_v18  ;;  %v317_v38 = vmul.f32 %v316_v23, %v313_v61  ;;  %v318_v35 = vmul.f32 %v316_v23, %v314_v62  ;;  %s1232_s30 = sld [smem:[#allocation3 + $0x1f]] }
  0x59   :  { %v374_v26 = vstv %s1153_s2  ;;  %v405_v32 = vadd.f32 %v403_v11, %v399_v19  ;;  %v406_v43 = vadd.f32 %v404_v12, %v400_v20  ;;  %v415_v44 = vmul.f32 %v414_v22, %v914_v28  ;;  %s1234_s8 = sld [smem:[#allocation8 + $0x5]] }
  0x5a   :  { %v371_v45 = vmax.f32 %v1179_v13, 0.0  ;;  %v372_v29 = vmax.f32 %v1181_v14, 0.0  ;;  %v416_v18 = vmul.f32 %v414_v22, %v923_v33  ;;  %v420_v30 = vstv %s1161_s18  ;;  %s1240_s9 = sld [smem:[#allocation5 + $0x1c]] }
  0x5b   :  { %v411_v31 = vadd.f32 %v409_v17, %v405_v32  ;;  %v412_v23 = vadd.f32 %v410_v21, %v406_v43  ;;  %v438_v46 = vstv %s1165_s19  ;;  %v442_v47 = vstv %s1169_s3  ;;  %s1244_s10 = sld [smem:[#allocation5 + $0x1d]] }
  0x5c   :  { %v439_v37 = vmul.f32 %v438_v46, %v830_v0  ;;  %v440_v48 = vmul.f32 %v438_v46, %v835_v1  ;;  %v443_v49 = vmul.f32 %v442_v47, %v842_v2  ;;  %v444_v27 = vmul.f32 %v442_v47, %v847_v3  ;;  %s1252_s6 = sld [smem:[#allocation5 + $0x1e]] }
  0x5d   :  { %v417_v39 = vadd.f32 %v415_v44, %v411_v31  ;;  %v421_v40 = vmul.f32 %v420_v30, %v939_v41  ;;  %v448_v50 = vstv %s1173_s17  ;;  %v454_v51 = vstv %s1177_s20  ;;  %s1256_s11 = sld [smem:[#allocation5 + $0x1f]] }
  0x5e   :  { %v445_v52 = vadd.f32 %v443_v49, %v439_v37  ;;  %v446_v53 = vadd.f32 %v444_v27, %v440_v48  ;;  %v449_v54 = vmul.f32 %v448_v50, %v854_v4  ;;  %v450_v55 = vmul.f32 %v448_v50, %v859_v5  ;;  %s1267_s12 = sld [smem:[#allocation8 + $0x6]] }
  0x5f   :  { %v418_v56 = vadd.f32 %v416_v18, %v412_v23  ;;  %v422_v57 = vmul.f32 %v420_v30, %v944_v42  ;;  %v455_v58 = vmul.f32 %v454_v51, %v866_v7  ;;  %v456_v59 = vmul.f32 %v454_v51, %v871_v8  ;;  %s1274_s13 = sld [smem:[#allocation7 + $0x7]] }
  0x60   :  { %v451_v60 = vadd.f32 %v449_v54, %v445_v52  ;;  %v452_v61 = vadd.f32 %v450_v55, %v446_v53  ;;  %v460_v62 = vstv %s1186_s22  ;;  %v466_v63 = vstv %s1191_s23  ;;  %s696_s1 = sld [smem:[#allocation8 + $0x7]] }
  0x61   :  { %v423_v6 = vadd.f32 %v421_v40, %v417_v39  ;;  %v426_v9 = vstv %s1195_s24  ;;  %v461_v10 = vmul.f32 %v460_v62, %v882_v15  ;;  %v462_v11 = vmul.f32 %v460_v62, %v887_v16 }
  0x62   :  { %v457_v12 = vadd.f32 %v455_v58, %v451_v60  ;;  %v458_v13 = vadd.f32 %v456_v59, %v452_v61  ;;  %v467_v14 = vmul.f32 %v466_v63, %v900_v24  ;;  %v468_v17 = vmul.f32 %v466_v63, %v905_v25 }
  0x63   :  { %v319_v19 = vadd.f32 %v317_v38, %v261_v34  ;;  %v424_v20 = vadd.f32 %v422_v57, %v418_v56  ;;  %v472_v21 = vstv %s1201_s25  ;;  %v478_v22 = vstv %s1205_s21 }
  0x64   :  { %v463_v32 = vadd.f32 %v461_v10, %v457_v12  ;;  %v464_v43 = vadd.f32 %v462_v11, %v458_v13  ;;  %v473_v44 = vmul.f32 %v472_v21, %v914_v28  ;;  %v474_v18 = vmul.f32 %v472_v21, %v923_v33 }
  0x65   :  { %v320_v30 = vadd.f32 %v318_v35, %v1189_v36  ;;  %v375_v31 = vmul.f32 %v374_v26, %v371_v45  ;;  %v376_v34 = vmul.f32 %v374_v26, %v372_v29  ;;  %v427_v38 = vadd.f32 %v426_v9, %v423_v6 }
  0x66   :  { %v469_v23 = vadd.f32 %v467_v14, %v463_v32  ;;  %v470_v46 = vadd.f32 %v468_v17, %v464_v43  ;;  %v479_v47 = vmul.f32 %v478_v22, %v939_v41  ;;  %v480_v37 = vmul.f32 %v478_v22, %v944_v42 }
  0x67   :  { %v428_v48 = vadd.f32 %v426_v9, %v424_v20  ;;  %v484_v49 = vstv %s1214_s26  ;;  %v496_v27 = vstv %s1218_s27  ;;  %v500_v39 = vstv %s1223_s28 }
  0x68   :  { %v475_v40 = vadd.f32 %v473_v44, %v469_v23  ;;  %v476_v50 = vadd.f32 %v474_v18, %v470_v46  ;;  %v497_v36 = vmul.f32 %v496_v27, %v830_v0  ;;  %v498_v35 = vmul.f32 %v496_v27, %v835_v1 }
  0x69   :  { %v501_v26 = vmul.f32 %v500_v39, %v842_v2  ;;  %v502_v45 = vmul.f32 %v500_v39, %v847_v3  ;;  %v506_v29 = vstv %s1227_s29  ;;  %v512_v51 = vstv %s1232_s30 }
  0x6a   :  { %v481_v52 = vadd.f32 %v479_v47, %v475_v40  ;;  %v482_v53 = vadd.f32 %v480_v37, %v476_v50  ;;  %v507_v54 = vmul.f32 %v506_v29, %v854_v4  ;;  %v508_v55 = vmul.f32 %v506_v29, %v859_v5 }
  0x6b   :  { %v503_v0 = vadd.f32 %v501_v26, %v497_v36  ;;  %v504_v56 = vadd.f32 %v502_v45, %v498_v35  ;;  %v513_v1 = vmul.f32 %v512_v51, %v866_v7  ;;  %v514_v57 = vmul.f32 %v512_v51, %v871_v8 }
  0x6c   :  { %v429_v58 = vmax.f32 %v427_v38, 0.0  ;;  %v432_v59 = vstv %s1234_s8  ;;  %v518_v2 = vstv %s1240_s9  ;;  %v524_v3 = vstv %s1244_s10 }
  0x6d   :  { %v509_v60 = vadd.f32 %v507_v54, %v503_v0  ;;  %v510_v61 = vadd.f32 %v508_v55, %v504_v56  ;;  %v519_v4 = vmul.f32 %v518_v2, %v882_v15  ;;  %v520_v5 = vmul.f32 %v518_v2, %v887_v16 }
  0x6e   :  { %v430_v62 = vmax.f32 %v428_v48, 0.0  ;;  %v485_v63 = vadd.f32 %v484_v49, %v481_v52  ;;  %v486_v6 = vadd.f32 %v484_v49, %v482_v53  ;;  %v525_v7 = vmul.f32 %v524_v3, %v900_v24 }
  0x6f   :  { %v515_v8 = vadd.f32 %v513_v1, %v509_v60  ;;  %v516_v9 = vadd.f32 %v514_v57, %v510_v61  ;;  %v526_v10 = vmul.f32 %v524_v3, %v905_v25  ;;  %v530_v11 = vstv %s1252_s6 }
  0x70   :  { %v377_v12 = vadd.f32 %v375_v31, %v319_v19  ;;  %v378_v13 = vadd.f32 %v376_v34, %v320_v30  ;;  %v536_v14 = vstv %s1256_s11  ;;  %v531_v21 = vmul.f32 %v530_v11, %v914_v28 }
  0x71   :  { %v521_v17 = vadd.f32 %v519_v4, %v515_v8  ;;  %v522_v20 = vadd.f32 %v520_v5, %v516_v9  ;;  %v532_v22 = vmul.f32 %v530_v11, %v923_v33  ;;  %v433_v32 = vmul.f32 %v432_v59, %v429_v58 }
  0x72   :  { %v434_v43 = vmul.f32 %v432_v59, %v430_v62  ;;  %v487_v44 = vmax.f32 %v485_v63, 0.0  ;;  %v488_v18 = vmax.f32 %v486_v6, 0.0  ;;  %v537_v46 = vmul.f32 %v536_v14, %v939_v41 }
  0x73   :  { %v527_v38 = vadd.f32 %v525_v7, %v521_v17  ;;  %v528_v23 = vadd.f32 %v526_v10, %v522_v20  ;;  %v538_v19 = vmul.f32 %v536_v14, %v944_v42  ;;  %v490_v30 = vstv %s1267_s12 }
  0x74   :  { %v435_v47 = vadd.f32 %v433_v32, %v377_v12  ;;  %v436_v37 = vadd.f32 %v434_v43, %v378_v13  ;;  %v542_v48 = vstv %s1274_s13  ;;  %v491_v49 = vmul.f32 %v490_v30, %v487_v44 }
  0x75   :  { %v533_v31 = vadd.f32 %v531_v21, %v527_v38  ;;  %v534_v34 = vadd.f32 %v532_v22, %v528_v23  ;;  %v492_v27 = vmul.f32 %v490_v30, %v488_v18  ;;  %v548_v35 = vstv %s696_s1 }
  0x76   :  { %v493_v26 = vadd.f32 %v491_v49, %v435_v47  ;;  %v554_v54 = vstv %s1324_s4 }
  0x77   :  { %v539_v39 = vadd.f32 %v537_v46, %v533_v31  ;;  %v540_v40 = vadd.f32 %v538_v19, %v534_v34  ;;  %v494_v45 = vadd.f32 %v492_v27, %v436_v37 }
  0x79   :  { %v543_v50 = vadd.f32 %v542_v48, %v539_v39  ;;  %v544_v36 = vadd.f32 %v542_v48, %v540_v40 }
  0x7b   :  { %v545_v29 = vmax.f32 %v543_v50, 0.0  ;;  %v546_v51 = vmax.f32 %v544_v36, 0.0 }
  0x7d   :  { %v549_v52 = vmul.f32 %v548_v35, %v545_v29  ;;  %v550_v53 = vmul.f32 %v548_v35, %v546_v51 }
  0x7f   :  { %v551_v55 = vadd.f32 %v549_v52, %v493_v26  ;;  %v552_v0 = vadd.f32 %v550_v53, %v494_v45 }
  0x81   :  { %v555_v56 = vadd.f32 %v554_v54, %v551_v55  ;;  %v556_v1 = vadd.f32 %v554_v54, %v552_v0 }
  0x83   :  { %v697_v57 = vmul.f32 -1.442695, %v555_v56  ;;  %v698_v58 = vmul.f32 -1.442695, %v556_v1 }
  0x85   :  { %709 = vpow2.f32 %v697_v57 }
  0x86   :  { %711 = vpow2.f32 %v698_v58 }
  0x8b   :  { %v710_v59 = vpop.eup %709 }
  0x8c   :  { %v712_v2 = vpop.eup %711  ;;  %v563_v3 = vadd.f32 1.0, %v710_v59 }
  0x8d   :  { %v564_v60 = vadd.f32 1.0, %v712_v2 }
  0x8e   :  { %713 = vrcp.f32 %v563_v3  ;;  %vm570_vm0 = vweird.f32 %v563_v3  ;;  %v576_v62 = vand.u32 2147483648, %v563_v3  ;;  %v574_v7 = vand.u32 2147483647, %v563_v3 }
  0x8f   :  { %715 = vrcp.f32 %v564_v60  ;;  %v591_v8 = vand.u32 2147483648, %v564_v60  ;;  %vm585_vm2 = vweird.f32 %v564_v60  ;;  %v589_v10 = vand.u32 2147483647, %v564_v60 }
  0x90   :  { %v577_v12 = vor.u32 1.1754944e-38, %v576_v62  ;;  %vm575_vm5 = vcmp.eq.f32.partialorder %v574_v7, 8.507059e+37 }
  0x91   :  { %v592_v17 = vor.u32 1.1754944e-38, %v591_v8  ;;  %vm590_vm7 = vcmp.eq.f32.partialorder %v589_v10, 8.507059e+37 }
  0x94   :  { %v714_v61 = vpop.eup %713 }
  0x95   :  { %v716_v4 = vpop.eup %715  ;;  %v566_v5 = vmul.f32 %v714_v61, %v563_v3  ;;  %vm571_vm1 = vweird.f32 %v714_v61 }
  0x96   :  { %v581_v63 = vmul.f32 %v716_v4, %v564_v60  ;;  %vm586_vm3 = vweird.f32 %v716_v4  ;;  %vm572_vm4 = vmor %vm570_vm0, %vm571_vm1 }
  0x97   :  { %v567_v6 = vsub.f32 1.0, %v566_v5  ;;  %vm587_vm6 = vmor %vm585_vm2, %vm586_vm3 }
  0x98   :  { %v582_v9 = vsub.f32 1.0, %v581_v63 }
  0x99   :  { %v568_v11 = vmul.f32 %v714_v61, %v567_v6 }
  0x9a   :  { %v583_v13 = vmul.f32 %v716_v4, %v582_v9 }
  0x9b   :  { %v569_v14 = vadd.f32 %v714_v61, %v568_v11 }
  0x9c   :  { %v584_v20 = vadd.f32 %v716_v4, %v583_v13 }
  0x9d   :  { %v573_v21 = vsel %vm572_vm4, %v714_v61, %v569_v14 }
  0x9e   :  { %v578_v22 = vsel %vm575_vm5, %v577_v12, %v573_v21  ;;  %v588_v32 = vsel %vm587_vm6, %v716_v4, %v584_v20 }
  0x9f   :  { %v593_v43 = vsel %vm590_vm7, %v592_v17, %v588_v32  ;;  %v595_v44 = vmul.f32 %v578_v22, %v882_v15  ;;  %v599_v18 = vmul.f32 %v578_v22, %v900_v24  ;;  %v604_v46 = vmul.f32 %v578_v22, %v914_v28 }
  0xa0   :  { %v596_v38 = vmul.f32 %v593_v43, %v887_v16  ;;  %v600_v23 = vmul.f32 %v593_v43, %v905_v25  ;;  %v605_v19 = vmul.f32 %v593_v43, %v923_v33  ;;  %v609_v15 = vmul.f32 %v578_v22, %v939_v41 }
  0xa1   :  { %597 = vst [vmem:[%s1327_s7] sm:$0x3] %v595_v44  ;;  %v610_v16 = vmul.f32 %v593_v43, %v944_v42 }
  0xa2   :  { %598 = vst [vmem:[%s1327_s7 + $0x8] sm:$0x3] %v596_v38 }
  0xa3   :  { %699 = vst [vmem:[%s1327_s7 + $0x2] sm:$0x3] %v599_v18 }
  0xa4   :  { %700 = vst [vmem:[%s1327_s7 + $0xa] sm:$0x3] %v600_v23 }
  0xa5   :  { %701 = vst [vmem:[%s1327_s7 + $0x4] sm:$0x3] %v604_v46 }
  0xa6   :  { %702 = vst [vmem:[%s1327_s7 + $0xc] sm:$0x3] %v605_v19 }
  0xa7   :  { %703 = vst [vmem:[%s1327_s7 + $0x6] sm:$0x3] %v609_v15 }
  0xa8   :  { %704 = vst [vmem:[%s1327_s7 + $0xe] sm:$0x3] %v610_v16 }
  0xa9   :  { %618 = vsyncpa [#allocation4], 1 }
  0xaa   :  { %619 = vsyncpa [#allocation6], 1 }
  0xab   :  { %620 = vsyncpa [#allocation9], 1 }

</bundles_post_ra>
